<compile_context>
chip_gen: v6e
topology: v6e:2x2x1
jax: 0.10.0
libtpu: 0.0.40
codegen_flags: <defaults>
</compile_context>

<pallas_src>
import functools

import jax
import jax.numpy as jnp
from jax.experimental import pallas as pl
from jax.experimental.pallas import tpu as pltpu

EPS = 1e-5
NEG_BIG = -1e30

# Embedding table specs from NYCTaxiFareFeatureCreator
EMB_SPECS = [(6, 3), (7, 4), (12, 6), (7, 4), (96, 50)]
DIM_CONT = 4
DIM_IN = DIM_CONT + sum(d for _, d in EMB_SPECS)        # 4 + 67 = 71
PAD_IN = 128                                            # padded feature width
VOCAB_TOTAL = sum(n for n, _ in EMB_SPECS)              # 6+7+12+7+96 = 128
VOCAB_OFFSETS = [0, 6, 13, 25, 32]                      # row offsets per table
PAD_OUT = 128                                           # padded output width


def mlp_kernel(cont_ref, idx_ref, emb_ref,
               w1_ref, b1_ref, g1_ref, be1_ref,
               w2_ref, b2_ref, g2_ref, be2_ref,
               w3_ref, b3_ref, g3_ref, be3_ref,
               w4_ref, b4_ref,
               out_ref):
    B = cont_ref.shape[0]
    V = emb_ref.shape[0]                                  # 128 (total vocab)

    # ---- fused feature creator: multi-hot @ combined embedding table ----
    lane = jax.lax.broadcasted_iota(jnp.int32, (B, V), 1)
    idx = idx_ref[...]                                    # (B, 5) int32, shifted
    mh = jnp.zeros((B, V), jnp.float32)
    for i in range(idx_ref.shape[1]):                     # static unroll (5)
        mh = mh + (idx[:, i:i + 1] == lane).astype(jnp.float32)
    # cont_ref is (B, 128) with cols 0..3 = continuous features, rest zero.
    # emb_ref columns 4..70 hold the concatenated embeddings -> exact gather.
    feat = cont_ref[...] + jnp.dot(mh, emb_ref[...],
                                   preferred_element_type=jnp.float32)

    def dense(x, w_ref, b_ref):
        # bf16 x bf16 MXU matmul with f32 accumulation, f32 bias add.
        return jnp.dot(x.astype(jnp.bfloat16), w_ref[...],
                       preferred_element_type=jnp.float32) + b_ref[...]

    def relu_bn(h, g_ref, be_ref):
        # ReLU then training-mode BatchNorm1d (biased batch stats), folded
        # into a single per-feature scale/shift.
        h = jnp.maximum(h, 0.0)
        mu = jnp.mean(h, axis=0, keepdims=True)
        var = jnp.mean(h * h, axis=0, keepdims=True) - mu * mu
        s = g_ref[...] * jax.lax.rsqrt(var + EPS)
        t = be_ref[...] - mu * s
        return h * s + t

    h = relu_bn(dense(feat, w1_ref, b1_ref), g1_ref, be1_ref)   # 128 -> 1024
    h = relu_bn(dense(h, w2_ref, b2_ref), g2_ref, be2_ref)      # 1024 -> 256
    h = relu_bn(dense(h, w3_ref, b3_ref), g3_ref, be3_ref)      # 256 -> 64

    # Final Linear(64 -> 128 padded) + Softmax(dim=1).  Padded bias entries
    # are -1e30 so exp() of padded columns is exactly 0.
    logits = dense(h, w4_ref, b4_ref)
    m = jnp.max(logits, axis=1, keepdims=True)
    e = jnp.exp(logits - m)
    denom = jnp.sum(e, axis=1, keepdims=True)
    out_ref[...] = e * pl.reciprocal(denom, approx=True)


def init_params(key, dim_out):
    """Deterministic parameter init (shapes as in the PyTorch module)."""
    ks = jax.random.split(key, 16)
    params = {}
    # Embedding tables (nn.Embedding default: N(0,1))
    params["emb"] = [
        jax.random.normal(ks[i], (n, d), jnp.float32)
        for i, (n, d) in enumerate(EMB_SPECS)
    ]
    dims = [(DIM_IN, 1024), (1024, 256), (256, 64), (64, dim_out)]
    for li, (din, dout) in enumerate(dims, start=1):
        scale = 1.0 / jnp.sqrt(jnp.float32(din))
        params[f"w{li}"] = (jax.random.normal(ks[4 + li], (din, dout), jnp.float32)
                            * scale)
        params[f"b{li}"] = jnp.zeros((1, dout), jnp.float32)
    for li, d in zip((1, 2, 3), (1024, 256, 64)):
        params[f"g{li}"] = jnp.ones((1, d), jnp.float32)     # BatchNorm weight
        params[f"be{li}"] = jnp.zeros((1, d), jnp.float32)   # BatchNorm bias
    return params


def prepare_params(params, dim_out):
    """One-time transform into kernel-ready (padded, bf16) parameters."""
    kp = {}

    # Combined embedding table: rows = stacked vocabularies (exactly 128),
    # columns = padded feature layout (embeddings occupy cols 4..70).
    emb = jnp.zeros((VOCAB_TOTAL, PAD_IN), jnp.float32)
    row, col = 0, DIM_CONT
    for table in params["emb"]:
        n, d = table.shape
        emb = emb.at[row:row + n, col:col + d].set(table)
        row += n
        col += d
    kp["emb"] = emb                                         # keep f32 (exact gather)

    # Linear 1: pad K 71 -> 128 with zero rows, store bf16.
    w1 = jnp.zeros((PAD_IN, 1024), jnp.float32).at[:DIM_IN, :].set(params["w1"])
    kp["w1"] = w1.astype(jnp.bfloat16)
    kp["b1"], kp["g1"], kp["be1"] = params["b1"], params["g1"], params["be1"]

    kp["w2"] = params["w2"].astype(jnp.bfloat16)
    kp["b2"], kp["g2"], kp["be2"] = params["b2"], params["g2"], params["be2"]

    kp["w3"] = params["w3"].astype(jnp.bfloat16)
    kp["b3"], kp["g3"], kp["be3"] = params["b3"], params["g3"], params["be3"]

    # Linear 4: pad N dim_out -> 128 (zero weight cols, -1e30 bias in padding).
    w4 = jnp.zeros((64, PAD_OUT), jnp.float32).at[:, :dim_out].set(params["w4"])
    kp["w4"] = w4.astype(jnp.bfloat16)
    b4 = jnp.full((1, PAD_OUT), NEG_BIG, jnp.float32).at[:, :dim_out].set(
        params["b4"][0])
    kp["b4"] = b4
    return kp


@functools.partial(jax.jit, static_argnames=("dim_out",))
def nyc_taxi_fare_forward(x, kparams, dim_out):
    batch = x.shape[0]

    # Continuous features, zero-padded into the (B, 128) feature layout.
    cont_pad = jnp.pad(x[:, :DIM_CONT], ((0, 0), (0, PAD_IN - DIM_CONT)))
    # Category indices shifted into the combined-vocab row space.
    idx = (x[:, DIM_CONT:].astype(jnp.int32)
           + jnp.asarray(VOCAB_OFFSETS, jnp.int32)[None, :])

    vmem_spec = pl.BlockSpec(memory_space=pltpu.MemorySpace.VMEM)
    operands = [
        cont_pad, idx, kparams["emb"],
        kparams["w1"], kparams["b1"], kparams["g1"], kparams["be1"],
        kparams["w2"], kparams["b2"], kparams["g2"], kparams["be2"],
        kparams["w3"], kparams["b3"], kparams["g3"], kparams["be3"],
        kparams["w4"], kparams["b4"],
    ]

    out_pad = pl.pallas_call(
        mlp_kernel,
        out_shape=jax.ShapeDtypeStruct((batch, PAD_OUT), jnp.float32),
        in_specs=[vmem_spec] * len(operands),
        out_specs=vmem_spec,
        compiler_params=pltpu.CompilerParams(vmem_limit_bytes=8 << 20),
    )(*operands)

    return out_pad[:, :dim_out]


def reference_forward(x, params, dim_out):
    """Pure-JAX f32 reference matching the PyTorch module (training mode)."""
    cont = x[:, :DIM_CONT]
    cats = x[:, DIM_CONT:].astype(jnp.int32)
    outs = [cont]
    for i, table in enumerate(params["emb"]):
        outs.append(jnp.take(table, cats[:, i], axis=0))
    h = jnp.concatenate(outs, axis=1)

    def bn(h, g, b):
        mu = jnp.mean(h, axis=0, keepdims=True)
        var = jnp.mean((h - mu) ** 2, axis=0, keepdims=True)
        return (h - mu) * jax.lax.rsqrt(var + EPS) * g + b

    for li in (1, 2, 3):
        h = h @ params[f"w{li}"] + params[f"b{li}"]
        h = jnp.maximum(h, 0.0)
        h = bn(h, params[f"g{li}"], params[f"be{li}"])
    logits = h @ params["w4"] + params["b4"]
    return jax.nn.softmax(logits, axis=1)


if __name__ == "__main__":
    dim_out = 8
    batch = 8

    key = jax.random.PRNGKey(0)
    k_param, k_cont, *k_cat = jax.random.split(key, 2 + len(EMB_SPECS))

    params = init_params(k_param, dim_out)
    kparams = prepare_params(params, dim_out)

    # Input x: first 4 columns continuous floats, last 5 columns are integer
    # category indices (stored as float, cast to int in forward).
    cont = jax.random.normal(k_cont, (batch, DIM_CONT), jnp.float32)
    cat_cols = [
        jax.random.randint(k_cat[i], (batch, 1), 0, n).astype(jnp.float32)
        for i, (n, _) in enumerate(EMB_SPECS)
    ]
    x = jnp.concatenate([cont] + cat_cols, axis=1)          # (8, 9)

    out = nyc_taxi_fare_forward(x, kparams, dim_out)
    jax.block_until_ready(out)

    assert out.shape == (batch, dim_out)
    # Softmax rows must sum to ~1 (approx reciprocal + bf16 weights -> loose tol).
    assert bool(jnp.all(jnp.abs(jnp.sum(out, axis=1) - 1.0) < 1e-2))
    # Compare against the pure-JAX f32 reference (bf16 weights -> loose tol).
    ref = reference_forward(x, params, dim_out)
    assert bool(jnp.max(jnp.abs(out - ref)) < 5e-2)
    print("KERNEL_OK")
</pallas_src>

<mosaic_0001>
module attributes {stable_mosaic.version = 11 : i64} {
  func.func @mlp_kernel(%arg0: memref<8x128xf32, #tpu.memory_space<vmem>>, %arg1: memref<8x5xi32, #tpu.memory_space<vmem>>, %arg2: memref<128x128xf32, #tpu.memory_space<vmem>>, %arg3: memref<128x1024xbf16, #tpu.memory_space<vmem>>, %arg4: memref<1x1024xf32, #tpu.memory_space<vmem>>, %arg5: memref<1x1024xf32, #tpu.memory_space<vmem>>, %arg6: memref<1x1024xf32, #tpu.memory_space<vmem>>, %arg7: memref<1024x256xbf16, #tpu.memory_space<vmem>>, %arg8: memref<1x256xf32, #tpu.memory_space<vmem>>, %arg9: memref<1x256xf32, #tpu.memory_space<vmem>>, %arg10: memref<1x256xf32, #tpu.memory_space<vmem>>, %arg11: memref<256x64xbf16, #tpu.memory_space<vmem>>, %arg12: memref<1x64xf32, #tpu.memory_space<vmem>>, %arg13: memref<1x64xf32, #tpu.memory_space<vmem>>, %arg14: memref<1x64xf32, #tpu.memory_space<vmem>>, %arg15: memref<64x128xbf16, #tpu.memory_space<vmem>>, %arg16: memref<1x128xf32, #tpu.memory_space<vmem>>, %arg17: memref<8x128xf32, #tpu.memory_space<vmem>>) attributes {dimension_semantics = [], scalar_prefetch = 0 : i64, scratch_operands = 0 : i64, tpu.core_type = #tpu.core_type<tc>} {
    %0 = tpu.iota {dimensions = array<i32: 1>} : vector<8x128xi32>
    %c0 = arith.constant 0 : index
    %c0_0 = arith.constant 0 : index
    %1 = vector.load %arg1[%c0, %c0_0] : memref<8x5xi32, #tpu.memory_space<vmem>>, vector<8x5xi32>
    %cst = arith.constant 0.000000e+00 : f32
    %2 = vector.broadcast %cst : f32 to vector<8x128xf32>
    %3 = vector.extract_strided_slice %1 {offsets = [0, 0], sizes = [8, 1], strides = [1, 1]} : vector<8x5xi32> to vector<8x1xi32>
    %4 = vector.broadcast %3 : vector<8x1xi32> to vector<8x128xi32>
    %5 = arith.cmpi eq, %4, %0 : vector<8x128xi32>
    %6 = arith.extui %5 : vector<8x128xi1> to vector<8x128xi32>
    %7 = arith.sitofp %6 : vector<8x128xi32> to vector<8x128xf32>
    %8 = arith.addf %2, %7 : vector<8x128xf32>
    %9 = vector.extract_strided_slice %1 {offsets = [0, 1], sizes = [8, 1], strides = [1, 1]} : vector<8x5xi32> to vector<8x1xi32>
    %10 = vector.broadcast %9 : vector<8x1xi32> to vector<8x128xi32>
    %11 = arith.cmpi eq, %10, %0 : vector<8x128xi32>
    %12 = arith.extui %11 : vector<8x128xi1> to vector<8x128xi32>
    %13 = arith.sitofp %12 : vector<8x128xi32> to vector<8x128xf32>
    %14 = arith.addf %8, %13 : vector<8x128xf32>
    %15 = vector.extract_strided_slice %1 {offsets = [0, 2], sizes = [8, 1], strides = [1, 1]} : vector<8x5xi32> to vector<8x1xi32>
    %16 = vector.broadcast %15 : vector<8x1xi32> to vector<8x128xi32>
    %17 = arith.cmpi eq, %16, %0 : vector<8x128xi32>
    %18 = arith.extui %17 : vector<8x128xi1> to vector<8x128xi32>
    %19 = arith.sitofp %18 : vector<8x128xi32> to vector<8x128xf32>
    %20 = arith.addf %14, %19 : vector<8x128xf32>
    %21 = vector.extract_strided_slice %1 {offsets = [0, 3], sizes = [8, 1], strides = [1, 1]} : vector<8x5xi32> to vector<8x1xi32>
    %22 = vector.broadcast %21 : vector<8x1xi32> to vector<8x128xi32>
    %23 = arith.cmpi eq, %22, %0 : vector<8x128xi32>
    %24 = arith.extui %23 : vector<8x128xi1> to vector<8x128xi32>
    %25 = arith.sitofp %24 : vector<8x128xi32> to vector<8x128xf32>
    %26 = arith.addf %20, %25 : vector<8x128xf32>
    %27 = vector.extract_strided_slice %1 {offsets = [0, 4], sizes = [8, 1], strides = [1, 1]} : vector<8x5xi32> to vector<8x1xi32>
    %28 = vector.broadcast %27 : vector<8x1xi32> to vector<8x128xi32>
    %29 = arith.cmpi eq, %28, %0 : vector<8x128xi32>
    %30 = arith.extui %29 : vector<8x128xi1> to vector<8x128xi32>
    %31 = arith.sitofp %30 : vector<8x128xi32> to vector<8x128xf32>
    %32 = arith.addf %26, %31 : vector<8x128xf32>
    %c0_1 = arith.constant 0 : index
    %c0_2 = arith.constant 0 : index
    %33 = vector.load %arg0[%c0_1, %c0_2] : memref<8x128xf32, #tpu.memory_space<vmem>>, vector<8x128xf32>
    %c0_3 = arith.constant 0 : index
    %c0_4 = arith.constant 0 : index
    %34 = vector.load %arg2[%c0_3, %c0_4] : memref<128x128xf32, #tpu.memory_space<vmem>>, vector<128x128xf32>
    %cst_5 = arith.constant dense<0.000000e+00> : vector<8x128xf32>
    %35 = tpu.matmul %32, %34, %cst_5 {dimension_numbers = #tpu.dot_dimension_numbers<[1], [0], [0], [1], [0, 0, 1, 1], [], []>} : vector<8x128xf32>, vector<128x128xf32>, vector<8x128xf32> -> vector<8x128xf32>
    %36 = arith.addf %33, %35 : vector<8x128xf32>
    %37 = arith.truncf %36 : vector<8x128xf32> to vector<8x128xbf16>
    %c0_6 = arith.constant 0 : index
    %c0_7 = arith.constant 0 : index
    %38 = vector.load %arg3[%c0_6, %c0_7] : memref<128x1024xbf16, #tpu.memory_space<vmem>>, vector<128x1024xbf16>
    %cst_8 = arith.constant dense<0.000000e+00> : vector<8x1024xf32>
    %39 = tpu.matmul %37, %38, %cst_8 {dimension_numbers = #tpu.dot_dimension_numbers<[1], [0], [0], [1], [0, 0, 1, 1], [], []>} : vector<8x128xbf16>, vector<128x1024xbf16>, vector<8x1024xf32> -> vector<8x1024xf32>
    %c0_9 = arith.constant 0 : index
    %c0_10 = arith.constant 0 : index
    %40 = vector.load %arg4[%c0_9, %c0_10] : memref<1x1024xf32, #tpu.memory_space<vmem>>, vector<1x1024xf32>
    %41 = vector.broadcast %40 : vector<1x1024xf32> to vector<8x1024xf32>
    %42 = arith.addf %39, %41 : vector<8x1024xf32>
    %cst_11 = arith.constant 0.000000e+00 : f32
    %43 = vector.broadcast %cst_11 : f32 to vector<8x1024xf32>
    %44 = arith.maximumf %42, %43 : vector<8x1024xf32>
    %cst_12 = arith.constant dense<0.000000e+00> : vector<1024xf32>
    %45 = vector.multi_reduction <add>, %44, %cst_12 [0] : vector<8x1024xf32> to vector<1024xf32>
    %46 = vector.shape_cast %45 : vector<1024xf32> to vector<1x1024xf32>
    %cst_13 = arith.constant 8.000000e+00 : f32
    %47 = vector.broadcast %cst_13 : f32 to vector<1x1024xf32>
    %48 = arith.divf %46, %47 : vector<1x1024xf32>
    %49 = arith.mulf %44, %44 : vector<8x1024xf32>
    %cst_14 = arith.constant dense<0.000000e+00> : vector<1024xf32>
    %50 = vector.multi_reduction <add>, %49, %cst_14 [0] : vector<8x1024xf32> to vector<1024xf32>
    %51 = vector.shape_cast %50 : vector<1024xf32> to vector<1x1024xf32>
    %cst_15 = arith.constant 8.000000e+00 : f32
    %52 = vector.broadcast %cst_15 : f32 to vector<1x1024xf32>
    %53 = arith.divf %51, %52 : vector<1x1024xf32>
    %54 = arith.mulf %48, %48 : vector<1x1024xf32>
    %55 = arith.subf %53, %54 : vector<1x1024xf32>
    %c0_16 = arith.constant 0 : index
    %c0_17 = arith.constant 0 : index
    %56 = vector.load %arg5[%c0_16, %c0_17] : memref<1x1024xf32, #tpu.memory_space<vmem>>, vector<1x1024xf32>
    %cst_18 = arith.constant 9.99999974E-6 : f32
    %57 = vector.broadcast %cst_18 : f32 to vector<1x1024xf32>
    %58 = arith.addf %55, %57 : vector<1x1024xf32>
    %59 = math.rsqrt %58 : vector<1x1024xf32>
    %60 = arith.mulf %56, %59 : vector<1x1024xf32>
    %c0_19 = arith.constant 0 : index
    %c0_20 = arith.constant 0 : index
    %61 = vector.load %arg6[%c0_19, %c0_20] : memref<1x1024xf32, #tpu.memory_space<vmem>>, vector<1x1024xf32>
    %62 = arith.mulf %48, %60 : vector<1x1024xf32>
    %63 = arith.subf %61, %62 : vector<1x1024xf32>
    %64 = vector.broadcast %60 : vector<1x1024xf32> to vector<8x1024xf32>
    %65 = arith.mulf %44, %64 : vector<8x1024xf32>
    %66 = vector.broadcast %63 : vector<1x1024xf32> to vector<8x1024xf32>
    %67 = arith.addf %65, %66 : vector<8x1024xf32>
    %68 = arith.truncf %67 : vector<8x1024xf32> to vector<8x1024xbf16>
    %c0_21 = arith.constant 0 : index
    %c0_22 = arith.constant 0 : index
    %69 = vector.load %arg7[%c0_21, %c0_22] : memref<1024x256xbf16, #tpu.memory_space<vmem>>, vector<1024x256xbf16>
    %cst_23 = arith.constant dense<0.000000e+00> : vector<8x256xf32>
    %70 = tpu.matmul %68, %69, %cst_23 {dimension_numbers = #tpu.dot_dimension_numbers<[1], [0], [0], [1], [0, 0, 1, 1], [], []>} : vector<8x1024xbf16>, vector<1024x256xbf16>, vector<8x256xf32> -> vector<8x256xf32>
    %c0_24 = arith.constant 0 : index
    %c0_25 = arith.constant 0 : index
    %71 = vector.load %arg8[%c0_24, %c0_25] : memref<1x256xf32, #tpu.memory_space<vmem>>, vector<1x256xf32>
    %72 = vector.broadcast %71 : vector<1x256xf32> to vector<8x256xf32>
    %73 = arith.addf %70, %72 : vector<8x256xf32>
    %cst_26 = arith.constant 0.000000e+00 : f32
    %74 = vector.broadcast %cst_26 : f32 to vector<8x256xf32>
    %75 = arith.maximumf %73, %74 : vector<8x256xf32>
    %cst_27 = arith.constant dense<0.000000e+00> : vector<256xf32>
    %76 = vector.multi_reduction <add>, %75, %cst_27 [0] : vector<8x256xf32> to vector<256xf32>
    %77 = vector.shape_cast %76 : vector<256xf32> to vector<1x256xf32>
    %cst_28 = arith.constant 8.000000e+00 : f32
    %78 = vector.broadcast %cst_28 : f32 to vector<1x256xf32>
    %79 = arith.divf %77, %78 : vector<1x256xf32>
    %80 = arith.mulf %75, %75 : vector<8x256xf32>
    %cst_29 = arith.constant dense<0.000000e+00> : vector<256xf32>
    %81 = vector.multi_reduction <add>, %80, %cst_29 [0] : vector<8x256xf32> to vector<256xf32>
    %82 = vector.shape_cast %81 : vector<256xf32> to vector<1x256xf32>
    %cst_30 = arith.constant 8.000000e+00 : f32
    %83 = vector.broadcast %cst_30 : f32 to vector<1x256xf32>
    %84 = arith.divf %82, %83 : vector<1x256xf32>
    %85 = arith.mulf %79, %79 : vector<1x256xf32>
    %86 = arith.subf %84, %85 : vector<1x256xf32>
    %c0_31 = arith.constant 0 : index
    %c0_32 = arith.constant 0 : index
    %87 = vector.load %arg9[%c0_31, %c0_32] : memref<1x256xf32, #tpu.memory_space<vmem>>, vector<1x256xf32>
    %cst_33 = arith.constant 9.99999974E-6 : f32
    %88 = vector.broadcast %cst_33 : f32 to vector<1x256xf32>
    %89 = arith.addf %86, %88 : vector<1x256xf32>
    %90 = math.rsqrt %89 : vector<1x256xf32>
    %91 = arith.mulf %87, %90 : vector<1x256xf32>
    %c0_34 = arith.constant 0 : index
    %c0_35 = arith.constant 0 : index
    %92 = vector.load %arg10[%c0_34, %c0_35] : memref<1x256xf32, #tpu.memory_space<vmem>>, vector<1x256xf32>
    %93 = arith.mulf %79, %91 : vector<1x256xf32>
    %94 = arith.subf %92, %93 : vector<1x256xf32>
    %95 = vector.broadcast %91 : vector<1x256xf32> to vector<8x256xf32>
    %96 = arith.mulf %75, %95 : vector<8x256xf32>
    %97 = vector.broadcast %94 : vector<1x256xf32> to vector<8x256xf32>
    %98 = arith.addf %96, %97 : vector<8x256xf32>
    %99 = arith.truncf %98 : vector<8x256xf32> to vector<8x256xbf16>
    %c0_36 = arith.constant 0 : index
    %c0_37 = arith.constant 0 : index
    %100 = vector.load %arg11[%c0_36, %c0_37] : memref<256x64xbf16, #tpu.memory_space<vmem>>, vector<256x64xbf16>
    %cst_38 = arith.constant dense<0.000000e+00> : vector<8x64xf32>
    %101 = tpu.matmul %99, %100, %cst_38 {dimension_numbers = #tpu.dot_dimension_numbers<[1], [0], [0], [1], [0, 0, 1, 1], [], []>} : vector<8x256xbf16>, vector<256x64xbf16>, vector<8x64xf32> -> vector<8x64xf32>
    %c0_39 = arith.constant 0 : index
    %c0_40 = arith.constant 0 : index
    %102 = vector.load %arg12[%c0_39, %c0_40] : memref<1x64xf32, #tpu.memory_space<vmem>>, vector<1x64xf32>
    %103 = vector.broadcast %102 : vector<1x64xf32> to vector<8x64xf32>
    %104 = arith.addf %101, %103 : vector<8x64xf32>
    %cst_41 = arith.constant 0.000000e+00 : f32
    %105 = vector.broadcast %cst_41 : f32 to vector<8x64xf32>
    %106 = arith.maximumf %104, %105 : vector<8x64xf32>
    %cst_42 = arith.constant dense<0.000000e+00> : vector<64xf32>
    %107 = vector.multi_reduction <add>, %106, %cst_42 [0] : vector<8x64xf32> to vector<64xf32>
    %108 = vector.shape_cast %107 : vector<64xf32> to vector<1x64xf32>
    %cst_43 = arith.constant 8.000000e+00 : f32
    %109 = vector.broadcast %cst_43 : f32 to vector<1x64xf32>
    %110 = arith.divf %108, %109 : vector<1x64xf32>
    %111 = arith.mulf %106, %106 : vector<8x64xf32>
    %cst_44 = arith.constant dense<0.000000e+00> : vector<64xf32>
    %112 = vector.multi_reduction <add>, %111, %cst_44 [0] : vector<8x64xf32> to vector<64xf32>
    %113 = vector.shape_cast %112 : vector<64xf32> to vector<1x64xf32>
    %cst_45 = arith.constant 8.000000e+00 : f32
    %114 = vector.broadcast %cst_45 : f32 to vector<1x64xf32>
    %115 = arith.divf %113, %114 : vector<1x64xf32>
    %116 = arith.mulf %110, %110 : vector<1x64xf32>
    %117 = arith.subf %115, %116 : vector<1x64xf32>
    %c0_46 = arith.constant 0 : index
    %c0_47 = arith.constant 0 : index
    %118 = vector.load %arg13[%c0_46, %c0_47] : memref<1x64xf32, #tpu.memory_space<vmem>>, vector<1x64xf32>
    %cst_48 = arith.constant 9.99999974E-6 : f32
    %119 = vector.broadcast %cst_48 : f32 to vector<1x64xf32>
    %120 = arith.addf %117, %119 : vector<1x64xf32>
    %121 = math.rsqrt %120 : vector<1x64xf32>
    %122 = arith.mulf %118, %121 : vector<1x64xf32>
    %c0_49 = arith.constant 0 : index
    %c0_50 = arith.constant 0 : index
    %123 = vector.load %arg14[%c0_49, %c0_50] : memref<1x64xf32, #tpu.memory_space<vmem>>, vector<1x64xf32>
    %124 = arith.mulf %110, %122 : vector<1x64xf32>
    %125 = arith.subf %123, %124 : vector<1x64xf32>
    %126 = vector.broadcast %122 : vector<1x64xf32> to vector<8x64xf32>
    %127 = arith.mulf %106, %126 : vector<8x64xf32>
    %128 = vector.broadcast %125 : vector<1x64xf32> to vector<8x64xf32>
    %129 = arith.addf %127, %128 : vector<8x64xf32>
    %130 = arith.truncf %129 : vector<8x64xf32> to vector<8x64xbf16>
    %c0_51 = arith.constant 0 : index
    %c0_52 = arith.constant 0 : index
    %131 = vector.load %arg15[%c0_51, %c0_52] : memref<64x128xbf16, #tpu.memory_space<vmem>>, vector<64x128xbf16>
    %cst_53 = arith.constant dense<0.000000e+00> : vector<8x128xf32>
    %132 = tpu.matmul %130, %131, %cst_53 {dimension_numbers = #tpu.dot_dimension_numbers<[1], [0], [0], [1], [0, 0, 1, 1], [], []>} : vector<8x64xbf16>, vector<64x128xbf16>, vector<8x128xf32> -> vector<8x128xf32>
    %c0_54 = arith.constant 0 : index
    %c0_55 = arith.constant 0 : index
    %133 = vector.load %arg16[%c0_54, %c0_55] : memref<1x128xf32, #tpu.memory_space<vmem>>, vector<1x128xf32>
    %134 = vector.broadcast %133 : vector<1x128xf32> to vector<8x128xf32>
    %135 = arith.addf %132, %134 : vector<8x128xf32>
    %cst_56 = arith.constant dense<0xFF800000> : vector<8xf32>
    %136 = vector.multi_reduction <maximumf>, %135, %cst_56 [1] : vector<8x128xf32> to vector<8xf32>
    %137 = vector.shape_cast %136 : vector<8xf32> to vector<8x1xf32>
    %138 = vector.broadcast %137 : vector<8x1xf32> to vector<8x128xf32>
    %139 = arith.subf %135, %138 : vector<8x128xf32>
    %140 = math.exp %139 : vector<8x128xf32>
    %cst_57 = arith.constant dense<0.000000e+00> : vector<8xf32>
    %141 = vector.multi_reduction <add>, %140, %cst_57 [1] : vector<8x128xf32> to vector<8xf32>
    %142 = vector.shape_cast %141 : vector<8xf32> to vector<8x1xf32>
    %143 = tpu.reciprocal %142 {approx = true} : vector<8x1xf32> -> vector<8x1xf32>
    %144 = vector.broadcast %143 : vector<8x1xf32> to vector<8x128xf32>
    %145 = arith.mulf %140, %144 : vector<8x128xf32>
    %c0_58 = arith.constant 0 : index
    %c0_59 = arith.constant 0 : index
    %146 = vector.load %arg17[%c0_58, %c0_59] : memref<8x128xf32, #tpu.memory_space<vmem>>, vector<8x128xf32>
    tpu.vector_store %arg17[%c0_58, %c0_59], %145 {strides = array<i32>} : memref<8x128xf32, #tpu.memory_space<vmem>>, vector<8x128xf32>,
    return
  }
}

</mosaic_0001>

<bundles_post_ra>
// kernel: nyc_taxi_fare_forward.1
= control target key start
LH: loop header
LB: loop body
LE: loop exit
PB: predicated region body
PF: predicated region fallthrough
CT: control target
= control target key end

     0   :  { %s3723_s0 = inlined_call_operand.vmem [shape: f32[8,128], index: 0, kind: input, shape index: {}]   ;;  %s3724_s1 = inlined_call_operand.vmem [shape: s32[8,5], index: 1, kind: input, shape index: {}]   ;;  %s3725_s2 = inlined_call_operand.vmem [shape: f32[128,128], index: 2, kind: input, shape index: {}]   ;;  %s3726_s3 = inlined_call_operand.hbm [shape: bf16[128,1024], index: 3, kind: input, shape index: {}]   ;;  %s3727_s4 = inlined_call_operand.vmem [shape: f32[1,1024], index: 4, kind: input, shape index: {}]   ;;  %s3728_s5 = inlined_call_operand.vmem [shape: f32[1,1024], index: 5, kind: input, shape index: {}]   ;;  %s3729_s6 = inlined_call_operand.vmem [shape: f32[1,1024], index: 6, kind: input, shape index: {}]   ;;  %s3730_s7 = inlined_call_operand.hbm [shape: bf16[1024,256], index: 7, kind: input, shape index: {}]   ;;  %s3731_s8 = inlined_call_operand.vmem [shape: f32[1,256], index: 8, kind: input, shape index: {}]   ;;  %s3732_s9 = inlined_call_operand.vmem [shape: f32[1,256], index: 9, kind: input, shape index: {}]   ;;  %s3733_s10 = inlined_call_operand.vmem [shape: f32[1,256], index: 10, kind: input, shape index: {}]   ;;  %s3734_s11 = inlined_call_operand.vmem [shape: bf16[256,64], index: 11, kind: input, shape index: {}]   ;;  %s3735_s12 = inlined_call_operand.vmem [shape: f32[1,64], index: 12, kind: input, shape index: {}]   ;;  %s3736_s13 = inlined_call_operand.vmem [shape: f32[1,64], index: 13, kind: input, shape index: {}]   ;;  %s3737_s14 = inlined_call_operand.vmem [shape: f32[1,64], index: 14, kind: input, shape index: {}]   ;;  %s3738_s15 = inlined_call_operand.vmem [shape: bf16[64,128], index: 15, kind: input, shape index: {}]   ;;  %s3739_s16 = inlined_call_operand.vmem [shape: f32[1,128], index: 16, kind: input, shape index: {}]   ;;  %s3740_s17 = inlined_call_operand.hbm [shape: f32[8,128], index: 17, kind: output, shape index: {}]  }
   0x1   :  { %3741 = sst [smem:[#allocation11_spill]] %s3723_s0 }
   0x2   :  { %3742 = sst [smem:[#allocation12_spill]] %s3724_s1 }
   0x3   :  { %22 = vsyncpa [#allocation3], 0 }
   0x4   :  { %23 = vsyncpa [#allocation6], 0 }
   0x5   :  { %24 = vsyncpa [#allocation4], 0  ;;  %s3214_s24 = smov [#allocation2]  }
   0x6   :  { %s36_s25 = sshll.u32 %s3214_s24, 4  ;;  %s37_s25 = int_to_ptr.vmem [resolvable:$true] %s36_s25 }
   0x7   :  { %s3156_s26 = scalar_lea.vmem %s37_s25, 8192  ;;  %p3161_p1 = scmp.lt.s32.totalorder %s37_s25, %s37_s25 }
   0x8   :  { %p3157_p0 = scmp.ne.s32.totalorder %s37_s25, %s3156_s26  ;;  %p3162_p2 = scmp.lt.s32.totalorder %s3156_s26, %s3156_s26 }
   0xa   :  { %p3163_p3 = por %p3162_p2, %p3161_p1 }
   0xc   :  { %p3164_p4 = pnand %p3163_p3, %p3157_p0 }
   0xe   :  { %3167 = shalt.err (!%p3164_p4)
}
   0xf   :  { %s3215_s27 = smov 512   ;;  %s3216_s28 = smov 32  }
  0x10   :  { %42 = dma.hbm_to_vmem [thread:$0]  %s3726_s3, 8192, %s37_s25, [#allocation3], %s3215_s27, %s3215_s27, %s3216_s28  }
  0x11   :  { %s3217_s30 = smov [#allocation5]  }
  0x12   :  { %s54_s18 = sshll.u32 %s3217_s30, 4  ;;  %s55_s18 = int_to_ptr.vmem [resolvable:$true] %s54_s18 }
  0x13   :  { %s3176_s19 = scalar_lea.vmem %s55_s18, 16384  ;;  %p3181_p6 = scmp.lt.s32.totalorder %s55_s18, %s55_s18 }
  0x14   :  { %p3177_p5 = scmp.ne.s32.totalorder %s55_s18, %s3176_s19  ;;  %p3182_p7 = scmp.lt.s32.totalorder %s3176_s19, %s3176_s19 }
  0x16   :  { %p3183_p8 = por %p3182_p7, %p3181_p6 }
  0x18   :  { %p3184_p9 = pnand %p3183_p8, %p3177_p5 }
  0x1a   :  { %3187 = shalt.err (!%p3184_p9)
}
  0x1b   :  { %s3218_s1 = smov 128   ;;  %s3219_s20 = smov 8  }
  0x1c   :  { %60 = dma.hbm_to_vmem [thread:$0]  %s3730_s7, 16384, %s55_s18, [#allocation6], %s3218_s1, %s3218_s1, %s3219_s20  }
  0x1d   :  { %3208 = dma.done.wait [#allocation3], 8192  }
  0x1e   :  { %3209 = vsyncadd [#allocation3], 4294959104 }
  0x1f   :  { %3210 = dma.done.wait [#allocation6], 16384  }
  0x20   :  { %3211 = vsyncadd [#allocation6], 4294950912  ;;  %v3220_v0 = vmov 0   ;;  %v3221_v1 = vmov 2   ;;  %v3222_v2 = vmov 0.0   ;;  %s3743_s24 = sld [smem:[#allocation12_spill]]  ;;  %v86_v55 = vlaneseq }
  0x21   :  { %2904 = vset.pattern.permute.xlu0 %v3220_v0  ;;  %2906 = vset.pattern.permute.xlu1 %v3221_v1  ;;  %v140_v4 = vld [vmem:[%s3725_s2 + $0x78] sm:$0xff]  ;;  %v139_v5 = vld [vmem:[%s3725_s2 + $0x70] sm:$0xff]  ;;  %v138_v6 = vld [vmem:[%s3725_s2 + $0x68] sm:$0xff]  ;;  %v3223_v7 = vmov 1   ;;  %v3224_v8 = vmov 3   ;;  %v3225_v11 = vmov 4  }
  0x22   :  { %2842 = vmatprep.subr.mxu0 %v3222_v2  ;;  %671 = vmatprep.mubr.bf16.mxu1 %v3220_v0  ;;  %v137_v9 = vld [vmem:[%s3725_s2 + $0x60] sm:$0xff]  ;;  %v136_v10 = vld [vmem:[%s3725_s2 + $0x58] sm:$0xff]  ;;  %v135_v12 = vld [vmem:[%s3725_s2 + $0x50] sm:$0xff]  ;;  %vm3226_vm0 = vmmov 0   ;;  %v87_v56 = vand.u32 127, %v86_v55  ;;  %vm2428_vm6 = vcmask 523264  }
  0x23   :  { %2843 = vmatpush3.msra.mxu0 %v140_v4  ;;  %v134_v13 = vld [vmem:[%s3725_s2 + $0x48] sm:$0xff]  ;;  %2874 = vmatprep.mubr.msk.f32.mxu0 %vm3226_vm0, %v3222_v2  ;;  %v269_v14 = vld [vmem:[#allocation2 + $0x1c0] sm:$0xff]  ;;  %v132_v26 = vld [vmem:[%s3725_s2 + $0x38] sm:$0xff] }
  0x24   :  { %2844 = vmatprep.subr.mxu0 %v3222_v2  ;;  %v273_v15 = vld [vmem:[#allocation2 + $0x1e0] sm:$0xff]  ;;  %v3358_v16 = vld [vmem:[#allocation2 + $0x1c8] sm:$0xff]  ;;  %v131_v29 = vld [vmem:[%s3725_s2 + $0x30] sm:$0xff] }
  0x25   :  { %2845 = vmatpush3.msra.mxu0 %v139_v5  ;;  %v2640_v17 = vcombine.high %v269_v14, %v273_v15  ;;  %v3361_v18 = vld [vmem:[#allocation2 + $0x1e8] sm:$0xff]  ;;  %v2639_v19 = vcombine.low %v269_v14, %v273_v15  ;;  %v261_v20 = vld [vmem:[#allocation2 + $0x180] sm:$0xff]  ;;  %v128_v38 = vld [vmem:[%s3725_s2 + $0x18] sm:$0xff] }
  0x26   :  { %v88_v3 = vld [vmem:[%s3743_s24] sm:$0xff]  ;;  %2846 = vmatprep.subr.mxu0 %v3222_v2  ;;  %v2641_v23 = vcombine.low %v3358_v16, %v3361_v18  ;;  %v130_v32 = vld [vmem:[%s3725_s2 + $0x28] sm:$0xff]  ;;  %v127_v41 = vld [vmem:[%s3725_s2 + $0x10] sm:$0xff]  ;;  %v2642_v49 = vcombine.high %v3358_v16, %v3361_v18  ;;  %s3744_s24 = sld [smem:[#allocation11_spill]] }
  0x27   :  { %90 = vperm.xlu0 %2904, %v88_v3   ;;  %104 = vperm.xlu1 %2906, %v88_v3   ;;  %v265_v21 = vld [vmem:[#allocation2 + $0x1a0] sm:$0xff]  ;;  %v126_v44 = vld [vmem:[%s3725_s2 + $0x8] sm:$0xff] }
  0x28   :  { %2847 = vmatpush3.msra.mxu0 %v138_v6  ;;  %v133_v22 = vld [vmem:[%s3725_s2 + $0x40] sm:$0xff]  ;;  %v2632_v24 = vcombine.high %v261_v20, %v265_v21  ;;  %639 = vmatprep.subr.bf16.mxu1 %v2640_v17  ;;  %v2631_v25 = vcombine.low %v261_v20, %v265_v21  ;;  %v262_v6 = vld [vmem:[#allocation2 + $0x188] sm:$0xff] }
  0x29   :  { %2848 = vmatprep.subr.mxu0 %v3222_v2  ;;  %640 = vmatpush1.bf16.msra.mxu1 %v2639_v19  ;;  %v253_v27 = vld [vmem:[#allocation2 + $0x140] sm:$0xff]  ;;  %v246_v17 = vld [vmem:[#allocation2 + $0x108] sm:$0xff] }
  0x2a   :  { %2849 = vmatpush3.msra.mxu0 %v137_v9  ;;  %641 = vmatprep.subr.bf16.mxu1 %v2632_v24  ;;  %v257_v28 = vld [vmem:[#allocation2 + $0x160] sm:$0xff]  ;;  %v250_v19 = vld [vmem:[#allocation2 + $0x128] sm:$0xff] }
  0x2b   :  { %2905 = vset.pattern.permute.xlu0 %v3223_v7  ;;  %2907 = vset.pattern.permute.xlu1 %v3224_v8  ;;  %v2624_v30 = vcombine.high %v253_v27, %v257_v28  ;;  %v2623_v31 = vcombine.low %v253_v27, %v257_v28  ;;  %v245_v33 = vld [vmem:[#allocation2 + $0x100] sm:$0xff]  ;;  %v266_v7 = vld [vmem:[#allocation2 + $0x1a8] sm:$0xff]  ;;  %v2618_v21 = vcombine.high %v246_v17, %v250_v19 }
  0x2c   :  { %97 = vperm.xlu0 %2905, %v88_v3   ;;  %111 = vperm.xlu1 %2907, %v88_v3   ;;  %v249_v34 = vld [vmem:[#allocation2 + $0x120] sm:$0xff]  ;;  %v2633_v14 = vcombine.low %v262_v6, %v266_v7  ;;  %v242_v24 = vld [vmem:[#allocation2 + $0xe8] sm:$0xff] }
  0x2d   :  { %2850 = vmatprep.subr.mxu0 %v3222_v2  ;;  %642 = vmatpush1.bf16.msra.mxu1 %v2631_v25  ;;  %v129_v35 = vld [vmem:[%s3725_s2 + $0x20] sm:$0xff]  ;;  %v2616_v36 = vcombine.high %v245_v33, %v249_v34  ;;  %v2615_v37 = vcombine.low %v245_v33, %v249_v34  ;;  %v2617_v25 = vcombine.low %v246_v17, %v250_v19  ;;  %v230_v27 = vld [vmem:[#allocation2 + $0x88] sm:$0xff]  ;;  %v243_v17 = vld [vmem:[#allocation2 + $0xf0] sm:$0xff] }
  0x2e   :  { %2851 = vmatpush3.msra.mxu0 %v136_v10  ;;  %643 = vmatprep.subr.bf16.mxu1 %v2624_v30  ;;  %v237_v39 = vld [vmem:[#allocation2 + $0xc0] sm:$0xff]  ;;  %v234_v16 = vld [vmem:[#allocation2 + $0xa8] sm:$0xff]  ;;  %v240_v19 = vld [vmem:[#allocation2 + $0xd8] sm:$0xff] }
  0x2f   :  { %2852 = vmatprep.subr.mxu0 %v3222_v2  ;;  %v241_v40 = vld [vmem:[#allocation2 + $0xe0] sm:$0xff]  ;;  %v222_v28 = vld [vmem:[#allocation2 + $0x48] sm:$0xff]  ;;  %v2601_v30 = vcombine.low %v230_v27, %v234_v16 }
  0x30   :  { %2908 = vset.pattern.permute.xlu1 %v3225_v11  ;;  %2909 = vset.pattern.permute.xlu0 %v3225_v11  ;;  %v2608_v42 = vcombine.high %v237_v39, %v241_v40  ;;  %v2607_v43 = vcombine.low %v237_v39, %v241_v40  ;;  %v229_v45 = vld [vmem:[#allocation2 + $0x80] sm:$0xff]  ;;  %v2634_v11 = vcombine.high %v262_v6, %v266_v7  ;;  %v247_v7 = vld [vmem:[#allocation2 + $0x110] sm:$0xff] }
  0x31   :  { %118 = vperm.xlu1 %2908, %v88_v3   ;;  %2853 = vmatpush3.msra.mxu0 %v135_v12  ;;  %v233_v46 = vld [vmem:[#allocation2 + $0xa0] sm:$0xff]  ;;  %v254_v12 = vld [vmem:[#allocation2 + $0x148] sm:$0xff] }
  0x32   :  { %2854 = vmatprep.subr.mxu0 %v3222_v2  ;;  %644 = vmatpush1.bf16.msra.mxu1 %v2623_v31  ;;  %v125_v47 = vld [vmem:[%s3725_s2] sm:$0xff]  ;;  %v2600_v48 = vcombine.high %v229_v45, %v233_v46  ;;  %v2599_v50 = vcombine.low %v229_v45, %v233_v46  ;;  %v276_v45 = vld [vmem:[#allocation2 + $0x1f8] sm:$0xff] }
  0x33   :  { %2855 = vmatpush3.msra.mxu0 %v134_v13  ;;  %645 = vmatprep.subr.bf16.mxu1 %v2616_v36  ;;  %v221_v51 = vld [vmem:[#allocation2 + $0x40] sm:$0xff]  ;;  %v258_v13 = vld [vmem:[#allocation2 + $0x168] sm:$0xff] }
  0x34   :  { %2856 = vmatprep.subr.mxu0 %v3222_v2  ;;  %v225_v52 = vld [vmem:[#allocation2 + $0x60] sm:$0xff]  ;;  %v2626_v15 = vcombine.high %v254_v12, %v258_v13  ;;  %v2625_v20 = vcombine.low %v254_v12, %v258_v13 }
  0x35   :  { %2857 = vmatpush3.msra.mxu0 %v133_v22  ;;  %v2592_v53 = vcombine.high %v221_v51, %v225_v52  ;;  %v2591_v54 = vcombine.low %v221_v51, %v225_v52  ;;  %v238_v22 = vld [vmem:[#allocation2 + $0xc8] sm:$0xff]  ;;  %v213_v33 = vld [vmem:[#allocation2] sm:$0xff]  ;;  %v267_v52 = vld [vmem:[#allocation2 + $0x1b0] sm:$0xff] }
  0x36   :  { %2858 = vmatprep.subr.mxu0 %v3222_v2  ;;  %646 = vmatpush1.bf16.msra.mxu1 %v2615_v37  ;;  %v2609_v18 = vcombine.low %v238_v22, %v242_v24  ;;  %v217_v34 = vld [vmem:[#allocation2 + $0x20] sm:$0xff]  ;;  %v218_v37 = vld [vmem:[#allocation2 + $0x28] sm:$0xff] }
  0x37   :  { %2859 = vmatpush3.msra.mxu0 %v132_v26  ;;  %647 = vmatprep.subr.bf16.mxu1 %v2608_v42  ;;  %v2610_v26 = vcombine.high %v238_v22, %v242_v24  ;;  %v2584_v36 = vcombine.high %v213_v33, %v217_v34  ;;  %v2583_v40 = vcombine.low %v213_v33, %v217_v34  ;;  %v275_v42 = vld [vmem:[#allocation2 + $0x1f0] sm:$0xff]  ;;  %v228_v33 = vld [vmem:[#allocation2 + $0x78] sm:$0xff] }
  0x38   :  { %2860 = vmatprep.subr.mxu0 %v3222_v2 }
  0x39   :  { %2861 = vmatpush3.msra.mxu0 %v131_v29  ;;  %v226_v29 = vld [vmem:[#allocation2 + $0x68] sm:$0xff] }
  0x3a   :  { %2862 = vmatprep.subr.mxu0 %v3222_v2  ;;  %648 = vmatpush1.bf16.msra.mxu1 %v2607_v43  ;;  %v2594_v31 = vcombine.high %v222_v28, %v226_v29  ;;  %v272_v43 = vld [vmem:[#allocation2 + $0x1d8] sm:$0xff] }
  0x3b   :  { %2863 = vmatpush3.msra.mxu0 %v130_v32  ;;  %649 = vmatprep.subr.bf16.mxu1 %v2600_v48  ;;  %v2593_v32 = vcombine.low %v222_v28, %v226_v29  ;;  %v2646_v48 = vcombine.high %v272_v43, %v276_v45 }
  0x3c   :  { %2864 = vmatprep.subr.mxu0 %v3222_v2 }
  0x3d   :  { %2865 = vmatpush3.msra.mxu0 %v129_v35  ;;  %v214_v35 = vld [vmem:[#allocation2 + $0x8] sm:$0xff] }
  0x3e   :  { %2866 = vmatprep.subr.mxu0 %v3222_v2  ;;  %650 = vmatpush1.bf16.msra.mxu1 %v2599_v50  ;;  %v2586_v39 = vcombine.high %v214_v35, %v218_v37  ;;  %v263_v50 = vld [vmem:[#allocation2 + $0x190] sm:$0xff] }
  0x3f   :  { %2867 = vmatpush3.msra.mxu0 %v128_v38  ;;  %651 = vmatprep.subr.bf16.mxu1 %v2592_v53  ;;  %v2585_v38 = vcombine.low %v214_v35, %v218_v37  ;;  %v264_v53 = vld [vmem:[#allocation2 + $0x198] sm:$0xff] }
  0x40   :  { %2868 = vmatprep.subr.mxu0 %v3222_v2 }
  0x41   :  { %2869 = vmatpush3.msra.mxu0 %v127_v41  ;;  %v271_v41 = vld [vmem:[#allocation2 + $0x1d0] sm:$0xff] }
  0x42   :  { %2870 = vmatprep.subr.mxu0 %v3222_v2  ;;  %652 = vmatpush1.bf16.msra.mxu1 %v2591_v54  ;;  %v2643_v46 = vcombine.low %v271_v41, %v275_v42  ;;  %v268_v54 = vld [vmem:[#allocation2 + $0x1b8] sm:$0xff] }
  0x43   :  { %2871 = vmatpush3.msra.mxu0 %v126_v44  ;;  %653 = vmatprep.subr.bf16.mxu1 %v2584_v36  ;;  %v2644_v44 = vcombine.high %v271_v41, %v275_v42  ;;  %v220_v41 = vld [vmem:[#allocation2 + $0x38] sm:$0xff] }
  0x44   :  { %2872 = vmatprep.subr.mxu0 %v3222_v2 }
  0x45   :  { %2873 = vmatpush3.msra.mxu0 %v125_v47  ;;  %v2645_v47 = vcombine.low %v272_v43, %v276_v45 }
  0x46   :  { %680 = vmatprep.subr.bf16.mxu0 %v2642_v49  ;;  %654 = vmatpush1.bf16.msra.mxu1 %v2583_v40  ;;  %v124_v49 = vld [vmem:[%s3744_s24] sm:$0xff]  ;;  %v216_v40 = vld [vmem:[#allocation2 + $0x18] sm:$0xff] }
  0x47   :  { %721 = vmatprep.subr.bf16.mxu1 %v2644_v44  ;;  %v2590_v45 = vcombine.high %v216_v40, %v220_v41 }
  0xa2   :  { %v91_v57 = vpop.permute.xlu0 %90  ;;  %v105_v58 = vpop.permute.xlu1 %104 }
  0xa3   :  { %vm92_vm1 = vcmp.eq.s32.totalorder %v91_v57, %v87_v56  ;;  %vm106_vm2 = vcmp.eq.s32.totalorder %v105_v58, %v87_v56 }
  0xa4   :  { %v2578_v61 = vsel %vm92_vm1, 1.0, %v3222_v2  ;;  %v2580_v1 = vsel %vm106_vm2, 1.0, %v3222_v2 }
  0xa7   :  { %v98_v59 = vpop.permute.xlu0 %97  ;;  %v112_v60 = vpop.permute.xlu1 %111 }
  0xa8   :  { %vm99_vm3 = vcmp.eq.s32.totalorder %v98_v59, %v87_v56  ;;  %vm113_vm4 = vcmp.eq.s32.totalorder %v112_v60, %v87_v56  ;;  %v2636_v59 = vcombine.high %v263_v50, %v267_v52  ;;  %v2638_v60 = vcombine.high %v264_v53, %v268_v54 }
  0xa9   :  { %v2579_v62 = vsel %vm99_vm3, 1.0, %v3222_v2  ;;  %v2581_v5 = vsel %vm113_vm4, 1.0, %v3222_v2 }
  0xaa   :  { %v102_v63 = vadd.f32 %v2579_v62, %v2578_v61  ;;  %v255_v61 = vld [vmem:[#allocation2 + $0x150] sm:$0xff] }
  0xab   :  { %v259_v62 = vld [vmem:[#allocation2 + $0x170] sm:$0xff] }
  0xac   :  { %v109_v3 = vadd.f32 %v2580_v1, %v102_v63  ;;  %v119_v4 = vpop.permute.xlu1 %118  ;;  %v256_v63 = vld [vmem:[#allocation2 + $0x158] sm:$0xff] }
  0xad   :  { %vm120_vm5 = vcmp.eq.s32.totalorder %v119_v4, %v87_v56  ;;  %v260_v1 = vld [vmem:[#allocation2 + $0x178] sm:$0xff]  ;;  %v2637_v4 = vcombine.low %v264_v53, %v268_v54  ;;  %v2921_v53 = vld [vmem:[#allocation5 + $0x164] ss:$8 sps:$4 sm:$0xff]   ;;  %v2916_v54 = vld [vmem:[#allocation5 + $0x60] ss:$8 sps:$4 sm:$0xff]  }
  0xae   :  { %v116_v8 = vadd.f32 %v2581_v5, %v109_v3  ;;  %v2582_v9 = vsel %vm120_vm5, 1.0, %v3222_v2  ;;  %v2635_v3 = vcombine.low %v263_v50, %v267_v52  ;;  %v2628_v5 = vcombine.high %v255_v61, %v259_v62  ;;  %v2910_v50 = vld [vmem:[#allocation5 + $0x70] ss:$8 sps:$4 sm:$0xff]   ;;  %v2918_v52 = vld [vmem:[#allocation5 + $0x64] ss:$8 sps:$4 sm:$0xff]  }
  0xaf   :  { %v2630_v6 = vcombine.high %v256_v63, %v260_v1  ;;  %v2629_v12 = vcombine.low %v256_v63, %v260_v1  ;;  %v2928_v63 = vld [vmem:[#allocation5 + $0x40] ss:$8 sps:$4 sm:$0xff]  }
  0xb0   :  { %v123_v10 = vadd.f32 %v2582_v9, %v116_v8  ;;  %v251_v8 = vld [vmem:[#allocation2 + $0x130] sm:$0xff]  ;;  %v248_v9 = vld [vmem:[#allocation2 + $0x118] sm:$0xff]  ;;  %v2931_v1 = vld [vmem:[#allocation5 + $0x140] ss:$8 sps:$4 sm:$0xff]  }
  0xb1   :  { %v2620_v13 = vcombine.high %v247_v7, %v251_v8 }
  0xb2   :  { %2875 = vmatmul.mubr.f32.vlgmr.msra.gmra.mxu0 %v123_v10  ;;  %v252_v10 = vld [vmem:[#allocation2 + $0x138] sm:$0xff] }
  0xb3   :  { %681 = vmatpush1.bf16.msra.mxu0 %v2641_v23  ;;  %712 = vmatprep.mubr.bf16.mxu0 %v3220_v0  ;;  %v2602_v23 = vcombine.high %v230_v27, %v234_v16  ;;  %v2621_v22 = vcombine.low %v248_v9, %v252_v10  ;;  %v232_v27 = vld [vmem:[#allocation2 + $0x98] sm:$0xff] }
  0xb4   :  { %682 = vmatprep.subr.bf16.mxu0 %v2634_v11  ;;  %v2627_v11 = vcombine.low %v255_v61, %v259_v62  ;;  %v236_v16 = vld [vmem:[#allocation2 + $0xb8] sm:$0xff]  ;;  %v2930_v61 = vld [vmem:[#allocation5 + $0x44] ss:$8 sps:$4 sm:$0xff]  }
  0xb5   :  { %v2606_v29 = vcombine.high %v232_v27, %v236_v16  ;;  %v2605_v35 = vcombine.low %v232_v27, %v236_v16  ;;  %v2933_v62 = vld [vmem:[#allocation5 + $0x144] ss:$8 sps:$4 sm:$0xff]   ;;  %v2964_v27 = vld [vmem:[#allocation5 + $0xe0] ss:$8 sps:$4 sm:$0xff]  }
  0xb6   :  { %v2967_v16 = vld [vmem:[#allocation5 + $0x1e0] ss:$8 sps:$4 sm:$0xff]  }
  0xb7   :  { %683 = vmatpush1.bf16.msra.mxu0 %v2633_v14  ;;  %v2622_v14 = vcombine.high %v248_v9, %v252_v10  ;;  %v2940_v9 = vld [vmem:[#allocation5 + $0x20] ss:$8 sps:$4 sm:$0xff]  }
  0xb8   :  { %684 = vmatprep.subr.bf16.mxu0 %v2626_v15  ;;  %v239_v15 = vld [vmem:[#allocation2 + $0xd0] sm:$0xff]  ;;  %v2943_v10 = vld [vmem:[#allocation5 + $0x120] ss:$8 sps:$4 sm:$0xff]  }
  0xb9   :  { %v2612_v24 = vcombine.high %v239_v15, %v243_v17 }
  0xbb   :  { %685 = vmatpush1.bf16.msra.mxu0 %v2625_v20  ;;  %v244_v20 = vld [vmem:[#allocation2 + $0xf8] sm:$0xff] }
  0xbc   :  { %686 = vmatprep.subr.bf16.mxu0 %v2618_v21  ;;  %v2619_v21 = vcombine.low %v247_v7, %v251_v8  ;;  %v2942_v7 = vld [vmem:[#allocation5 + $0x24] ss:$8 sps:$4 sm:$0xff]  }
  0xbd   :  { %v2945_v8 = vld [vmem:[#allocation5 + $0x124] ss:$8 sps:$4 sm:$0xff]  }
  0xbf   :  { %687 = vmatpush1.bf16.msra.mxu0 %v2617_v25  ;;  %v231_v25 = vld [vmem:[#allocation2 + $0x90] sm:$0xff] }
  0xc0   :  { %688 = vmatprep.subr.bf16.mxu0 %v2610_v26  ;;  %v235_v26 = vld [vmem:[#allocation2 + $0xb0] sm:$0xff] }
  0xc1   :  { %v2604_v28 = vcombine.high %v231_v25, %v235_v26  ;;  %v2603_v34 = vcombine.low %v231_v25, %v235_v26  ;;  %v2966_v25 = vld [vmem:[#allocation5 + $0xe4] ss:$8 sps:$4 sm:$0xff]  }
  0xc2   :  { %v2969_v26 = vld [vmem:[#allocation5 + $0x1e4] ss:$8 sps:$4 sm:$0xff]  }
  0xc3   :  { %689 = vmatpush1.bf16.msra.mxu0 %v2609_v18  ;;  %v2611_v18 = vcombine.low %v239_v15, %v243_v17  ;;  %v2954_v15 = vld [vmem:[#allocation5 + $0x4] ss:$8 sps:$4 sm:$0xff]  }
  0xc4   :  { %690 = vmatprep.subr.bf16.mxu0 %v2602_v23  ;;  %v2613_v23 = vcombine.low %v240_v19, %v244_v20  ;;  %v2957_v17 = vld [vmem:[#allocation5 + $0x104] ss:$8 sps:$4 sm:$0xff]  }
  0xc7   :  { %691 = vmatpush1.bf16.msra.mxu0 %v2601_v30  ;;  %v223_v30 = vld [vmem:[#allocation2 + $0x50] sm:$0xff] }
  0xc8   :  { %692 = vmatprep.subr.bf16.mxu0 %v2594_v31  ;;  %v227_v31 = vld [vmem:[#allocation2 + $0x70] sm:$0xff] }
  0xc9   :  { %v2596_v36 = vcombine.high %v223_v30, %v227_v31  ;;  %v2595_v42 = vcombine.low %v223_v30, %v227_v31  ;;  %v2978_v30 = vld [vmem:[#allocation5 + $0xc4] ss:$8 sps:$4 sm:$0xff]  }
  0xca   :  { %v2981_v31 = vld [vmem:[#allocation5 + $0x1c4] ss:$8 sps:$4 sm:$0xff]  }
  0xcb   :  { %693 = vmatpush1.bf16.msra.mxu0 %v2593_v32  ;;  %v224_v32 = vld [vmem:[#allocation2 + $0x58] sm:$0xff] }
  0xcc   :  { %694 = vmatprep.subr.bf16.mxu0 %v2586_v39  ;;  %v2598_v37 = vcombine.high %v224_v32, %v228_v33  ;;  %v219_v39 = vld [vmem:[#allocation2 + $0x30] sm:$0xff]  ;;  %v2597_v43 = vcombine.low %v224_v32, %v228_v33  ;;  %v2976_v32 = vld [vmem:[#allocation5 + $0xc0] ss:$8 sps:$4 sm:$0xff]  }
  0xcd   :  { %v2979_v33 = vld [vmem:[#allocation5 + $0x1c0] ss:$8 sps:$4 sm:$0xff]  }
  0xcf   :  { %695 = vmatpush1.bf16.msra.mxu0 %v2585_v38  ;;  %v215_v38 = vld [vmem:[#allocation2 + $0x10] sm:$0xff] }
  0xd0   :  { %762 = vmatprep.subr.bf16.mxu0 %v2646_v48  ;;  %v2588_v44 = vcombine.high %v215_v38, %v219_v39  ;;  %v2912_v48 = vld [vmem:[#allocation5 + $0x74] ss:$8 sps:$4 sm:$0xff]  }
 0x172   :  { %v207_v51 = vpop.f32.mrf.mxu0 }
 0x173   :  { %v211_v56 = vadd.f32 %v207_v51, %v124_v49  ;;  %v2915_v49 = vld [vmem:[#allocation5 + $0x174] ss:$8 sps:$4 sm:$0xff]   ;;  %v2913_v51 = vld [vmem:[#allocation5 + $0x170] ss:$8 sps:$4 sm:$0xff]  }
 0x174   :  { %v2876_v57 = vpop.f32.mrf.mxu0 }
 0x175   :  { %v3417_v58 = vpack.c.bf16 %v211_v56, %v211_v56  ;;  %v2919_v56 = vld [vmem:[#allocation5 + $0x160] ss:$8 sps:$4 sm:$0xff]   ;;  %v2924_v57 = vld [vmem:[#allocation5 + $0x54] ss:$8 sps:$4 sm:$0xff]  }
 0x177   :  { %672 = vmatmul.mubr.bf16.vlgmr.msra.gmra.mxu1 %v3417_v58  ;;  %713 = vmatmul.mubr.bf16.vlgmr.msra.gmra.mxu0 %v3417_v58 }
 0x178   :  { %722 = vmatpush1.bf16.msra.mxu1 %v2643_v46  ;;  %763 = vmatpush1.bf16.msra.mxu0 %v2645_v47  ;;  %v2587_v46 = vcombine.low %v215_v38, %v219_v39  ;;  %v2589_v47 = vcombine.low %v216_v40, %v220_v41  ;;  %v2990_v38 = vld [vmem:[#allocation5 + $0xa4] ss:$8 sps:$4 sm:$0xff]   ;;  %v2988_v40 = vld [vmem:[#allocation5 + $0xa0] ss:$8 sps:$4 sm:$0xff]  }
 0x179   :  { %723 = vmatprep.subr.bf16.mxu1 %v2636_v59  ;;  %764 = vmatprep.subr.bf16.mxu0 %v2638_v60  ;;  %v2927_v59 = vld [vmem:[#allocation5 + $0x154] ss:$8 sps:$4 sm:$0xff]   ;;  %v2922_v60 = vld [vmem:[#allocation5 + $0x50] ss:$8 sps:$4 sm:$0xff]   ;;  %v2993_v39 = vld [vmem:[#allocation5 + $0x1a4] ss:$8 sps:$4 sm:$0xff]  }
 0x17a   :  { %753 = vmatprep.mubr.bf16.mxu1 %v3220_v0  ;;  %794 = vmatprep.mubr.bf16.mxu0 %v3220_v0  ;;  %v2614_v0 = vcombine.high %v240_v19, %v244_v20  ;;  %v2952_v19 = vld [vmem:[#allocation5] ss:$8 sps:$4 sm:$0xff]  }
 0x17b   :  { %v2955_v20 = vld [vmem:[#allocation5 + $0x100] ss:$8 sps:$4 sm:$0xff]  }
 0x17c   :  { %724 = vmatpush1.bf16.msra.mxu1 %v2635_v3  ;;  %765 = vmatpush1.bf16.msra.mxu0 %v2637_v4  ;;  %v2936_v3 = vld [vmem:[#allocation5 + $0x34] ss:$8 sps:$4 sm:$0xff]   ;;  %v2991_v41 = vld [vmem:[#allocation5 + $0x1a0] ss:$8 sps:$4 sm:$0xff]  }
 0x17d   :  { %725 = vmatprep.subr.bf16.mxu1 %v2628_v5  ;;  %766 = vmatprep.subr.bf16.mxu0 %v2630_v6  ;;  %v2939_v4 = vld [vmem:[#allocation5 + $0x134] ss:$8 sps:$4 sm:$0xff]   ;;  %v2934_v5 = vld [vmem:[#allocation5 + $0x30] ss:$8 sps:$4 sm:$0xff]  }
 0x17e   :  { %v2937_v6 = vld [vmem:[#allocation5 + $0x130] ss:$8 sps:$4 sm:$0xff]  }
 0x180   :  { %726 = vmatpush1.bf16.msra.mxu1 %v2627_v11  ;;  %767 = vmatpush1.bf16.msra.mxu0 %v2629_v12  ;;  %v2948_v11 = vld [vmem:[#allocation5 + $0x14] ss:$8 sps:$4 sm:$0xff]  }
 0x181   :  { %727 = vmatprep.subr.bf16.mxu1 %v2620_v13  ;;  %768 = vmatprep.subr.bf16.mxu0 %v2622_v14  ;;  %v2951_v12 = vld [vmem:[#allocation5 + $0x114] ss:$8 sps:$4 sm:$0xff]   ;;  %v2946_v13 = vld [vmem:[#allocation5 + $0x10] ss:$8 sps:$4 sm:$0xff]  }
 0x182   :  { %v2949_v14 = vld [vmem:[#allocation5 + $0x110] ss:$8 sps:$4 sm:$0xff]  }
 0x184   :  { %728 = vmatpush1.bf16.msra.mxu1 %v2619_v21  ;;  %769 = vmatpush1.bf16.msra.mxu0 %v2621_v22  ;;  %v2960_v21 = vld [vmem:[#allocation5 + $0xf4] ss:$8 sps:$4 sm:$0xff]  }
 0x185   :  { %729 = vmatprep.subr.bf16.mxu1 %v2612_v24  ;;  %770 = vmatprep.subr.bf16.mxu0 %v2614_v0  ;;  %v2963_v22 = vld [vmem:[#allocation5 + $0x1f4] ss:$8 sps:$4 sm:$0xff]   ;;  %v2958_v24 = vld [vmem:[#allocation5 + $0xf0] ss:$8 sps:$4 sm:$0xff]  }
 0x186   :  { %v2961_v0 = vld [vmem:[#allocation5 + $0x1f0] ss:$8 sps:$4 sm:$0xff]  }
 0x188   :  { %730 = vmatpush1.bf16.msra.mxu1 %v2611_v18  ;;  %771 = vmatpush1.bf16.msra.mxu0 %v2613_v23  ;;  %v2972_v18 = vld [vmem:[#allocation5 + $0xd4] ss:$8 sps:$4 sm:$0xff]  }
 0x189   :  { %731 = vmatprep.subr.bf16.mxu1 %v2604_v28  ;;  %772 = vmatprep.subr.bf16.mxu0 %v2606_v29  ;;  %v2975_v23 = vld [vmem:[#allocation5 + $0x1d4] ss:$8 sps:$4 sm:$0xff]   ;;  %v2970_v28 = vld [vmem:[#allocation5 + $0xd0] ss:$8 sps:$4 sm:$0xff]  }
 0x18a   :  { %v2973_v29 = vld [vmem:[#allocation5 + $0x1d0] ss:$8 sps:$4 sm:$0xff]  }
 0x18c   :  { %732 = vmatpush1.bf16.msra.mxu1 %v2603_v34  ;;  %773 = vmatpush1.bf16.msra.mxu0 %v2605_v35  ;;  %v2984_v34 = vld [vmem:[#allocation5 + $0xb4] ss:$8 sps:$4 sm:$0xff]  }
 0x18d   :  { %733 = vmatprep.subr.bf16.mxu1 %v2596_v36  ;;  %774 = vmatprep.subr.bf16.mxu0 %v2598_v37  ;;  %v2987_v35 = vld [vmem:[#allocation5 + $0x1b4] ss:$8 sps:$4 sm:$0xff]   ;;  %v2982_v36 = vld [vmem:[#allocation5 + $0xb0] ss:$8 sps:$4 sm:$0xff]  }
 0x18e   :  { %v2985_v37 = vld [vmem:[#allocation5 + $0x1b0] ss:$8 sps:$4 sm:$0xff]  }
 0x190   :  { %734 = vmatpush1.bf16.msra.mxu1 %v2595_v42  ;;  %775 = vmatpush1.bf16.msra.mxu0 %v2597_v43  ;;  %v2996_v42 = vld [vmem:[#allocation5 + $0x94] ss:$8 sps:$4 sm:$0xff]   ;;  %v2994_v43 = vld [vmem:[#allocation5 + $0x90] ss:$8 sps:$4 sm:$0xff]  }
 0x191   :  { %735 = vmatprep.subr.bf16.mxu1 %v2588_v44  ;;  %776 = vmatprep.subr.bf16.mxu0 %v2590_v45  ;;  %v2997_v44 = vld [vmem:[#allocation5 + $0x190] ss:$8 sps:$4 sm:$0xff]   ;;  %v2999_v45 = vld [vmem:[#allocation5 + $0x194] ss:$8 sps:$4 sm:$0xff]  }
 0x194   :  { %736 = vmatpush1.bf16.msra.mxu1 %v2587_v46  ;;  %777 = vmatpush1.bf16.msra.mxu0 %v2589_v47  ;;  %v3002_v46 = vld [vmem:[#allocation5 + $0x84] ss:$8 sps:$4 sm:$0xff]  }
 0x195   :  { %1978 = vmatprep.subr.bf16.mxu1 %v2912_v48  ;;  %2019 = vmatprep.subr.bf16.mxu0 %v2915_v49  ;;  %v3005_v47 = vld [vmem:[#allocation5 + $0x184] ss:$8 sps:$4 sm:$0xff]   ;;  %v3000_v48 = vld [vmem:[#allocation5 + $0x80] ss:$8 sps:$4 sm:$0xff]  }
 0x196   :  { %v3003_v49 = vld [vmem:[#allocation5 + $0x180] ss:$8 sps:$4 sm:$0xff]  }
 0x197   :  { %754 = vmatmul.mubr.bf16.vlgmr.msra.gmra.mxu1 %v3417_v58  ;;  %795 = vmatmul.mubr.bf16.vlgmr.msra.gmra.mxu0 %v3417_v58  ;;  %v2925_v58 = vld [vmem:[#allocation5 + $0x150] ss:$8 sps:$4 sm:$0xff]  }
 0x198   :  { %1979 = vmatpush1.bf16.msra.mxu1 %v2910_v50  ;;  %2020 = vmatpush1.bf16.msra.mxu0 %v2913_v51  ;;  %v3426_v50 = vshrl.u32 %v86_v55, 7  ;;  %v3008_v51 = vld [vmem:[#allocation5 + $0x274] ss:$8 sps:$4 sm:$0xff]  }
 0x199   :  { %1980 = vmatprep.subr.bf16.mxu1 %v2918_v52  ;;  %2021 = vmatprep.subr.bf16.mxu0 %v2921_v53  ;;  %v3011_v52 = vld [vmem:[#allocation5 + $0x374] ss:$8 sps:$4 sm:$0xff]  }
 0x19a   :  { %v3429_v53 = vsub.s32 0, %v3426_v50 }
 0x19c   :  { %1981 = vmatpush1.bf16.msra.mxu1 %v2916_v54  ;;  %2022 = vmatpush1.bf16.msra.mxu0 %v2919_v56  ;;  %v3434_v54 = vld [vmem:[%s3727_s4] sm:$0xff]  ;;  %v3437_v56 = vsub.s32 2, %v3426_v50 }
 0x19d   :  { %1982 = vmatprep.subr.bf16.mxu1 %v2924_v57  ;;  %2023 = vmatprep.subr.bf16.mxu0 %v2927_v59  ;;  %v3440_v57 = vsub.s32 1, %v3426_v50  ;;  %v282_v55 = vrot.slane %v3434_v54, %v3429_v53 }
 0x19e   :  { %v290_v59 = vrot.slane %v3434_v54, %v3437_v56 }
 0x1a0   :  { %1983 = vmatpush1.bf16.msra.mxu1 %v2922_v60  ;;  %2024 = vmatpush1.bf16.msra.mxu0 %v2925_v58  ;;  %v3447_v60 = vsub.s32 3, %v3426_v50 }
 0x1a1   :  { %1984 = vmatprep.subr.bf16.mxu1 %v2930_v61  ;;  %2025 = vmatprep.subr.bf16.mxu0 %v2933_v62  ;;  %v286_v62 = vrot.slane %v3434_v54, %v3440_v57 }
 0x1a4   :  { %1985 = vmatpush1.bf16.msra.mxu1 %v2928_v63  ;;  %2026 = vmatpush1.bf16.msra.mxu0 %v2931_v1 }
 0x1a5   :  { %1986 = vmatprep.subr.bf16.mxu1 %v2936_v3  ;;  %2027 = vmatprep.subr.bf16.mxu0 %v2939_v4  ;;  %v294_v4 = vrot.slane %v3434_v54, %v3447_v60 }
 0x1a8   :  { %1987 = vmatpush1.bf16.msra.mxu1 %v2934_v5  ;;  %2028 = vmatpush1.bf16.msra.mxu0 %v2937_v6 }
 0x1a9   :  { %1988 = vmatprep.subr.bf16.mxu1 %v2942_v7  ;;  %2029 = vmatprep.subr.bf16.mxu0 %v2945_v8 }
 0x1ac   :  { %1989 = vmatpush1.bf16.msra.mxu1 %v2940_v9  ;;  %2030 = vmatpush1.bf16.msra.mxu0 %v2943_v10 }
 0x1ad   :  { %1990 = vmatprep.subr.bf16.mxu1 %v2948_v11  ;;  %2031 = vmatprep.subr.bf16.mxu0 %v2951_v12 }
 0x1b0   :  { %1991 = vmatpush1.bf16.msra.mxu1 %v2946_v13  ;;  %2032 = vmatpush1.bf16.msra.mxu0 %v2949_v14 }
 0x1b1   :  { %1992 = vmatprep.subr.bf16.mxu1 %v2954_v15  ;;  %2033 = vmatprep.subr.bf16.mxu0 %v2957_v17 }
 0x1b4   :  { %1993 = vmatpush1.bf16.msra.mxu1 %v2952_v19  ;;  %2034 = vmatpush1.bf16.msra.mxu0 %v2955_v20 }
 0x1b5   :  { %1994 = vmatprep.subr.bf16.mxu1 %v2960_v21  ;;  %2035 = vmatprep.subr.bf16.mxu0 %v2963_v22 }
 0x1b8   :  { %1995 = vmatpush2.bf16.msra.mxu1 %v2958_v24  ;;  %2036 = vmatpush2.bf16.msra.mxu0 %v2961_v0 }
 0x1b9   :  { %1996 = vmatprep.subr.bf16.mxu1 %v2966_v25  ;;  %2037 = vmatprep.subr.bf16.mxu0 %v2969_v26 }
 0x1bc   :  { %1997 = vmatpush2.bf16.msra.mxu1 %v2964_v27  ;;  %2038 = vmatpush2.bf16.msra.mxu0 %v2967_v16 }
 0x1bd   :  { %1998 = vmatprep.subr.bf16.mxu1 %v2972_v18  ;;  %2039 = vmatprep.subr.bf16.mxu0 %v2975_v23 }
 0x1c0   :  { %1999 = vmatpush2.bf16.msra.mxu1 %v2970_v28  ;;  %2040 = vmatpush2.bf16.msra.mxu0 %v2973_v29 }
 0x1c1   :  { %2000 = vmatprep.subr.bf16.mxu1 %v2978_v30  ;;  %2041 = vmatprep.subr.bf16.mxu0 %v2981_v31 }
 0x1c4   :  { %2001 = vmatpush2.bf16.msra.mxu1 %v2976_v32  ;;  %2042 = vmatpush2.bf16.msra.mxu0 %v2979_v33 }
 0x1c5   :  { %2002 = vmatprep.subr.bf16.mxu1 %v2984_v34  ;;  %2043 = vmatprep.subr.bf16.mxu0 %v2987_v35 }
 0x1c8   :  { %2003 = vmatpush2.bf16.msra.mxu1 %v2982_v36  ;;  %2044 = vmatpush2.bf16.msra.mxu0 %v2985_v37 }
 0x1c9   :  { %2004 = vmatprep.subr.bf16.mxu1 %v2990_v38  ;;  %2045 = vmatprep.subr.bf16.mxu0 %v2993_v39 }
 0x1cc   :  { %2005 = vmatpush2.bf16.msra.mxu1 %v2988_v40  ;;  %2046 = vmatpush2.bf16.msra.mxu0 %v2991_v41 }
 0x1cd   :  { %2006 = vmatprep.subr.bf16.mxu1 %v2996_v42  ;;  %2047 = vmatprep.subr.bf16.mxu0 %v2999_v45 }
 0x1d0   :  { %2007 = vmatpush2.bf16.msra.mxu1 %v2994_v43  ;;  %2048 = vmatpush2.bf16.msra.mxu0 %v2997_v44 }
 0x1d1   :  { %2008 = vmatprep.subr.bf16.mxu1 %v3002_v46  ;;  %2049 = vmatprep.subr.bf16.mxu0 %v3005_v47  ;;  %v3478_v46 = vsub.s32 4, %v3426_v50  ;;  %v3481_v47 = vsub.s32 6, %v3426_v50 }
 0x1d4   :  { %2009 = vmatpush2.bf16.msra.mxu1 %v3000_v48  ;;  %2050 = vmatpush2.bf16.msra.mxu0 %v3003_v49 }
 0x1d5   :  { %2060 = vmatprep.subr.bf16.mxu1 %v3008_v51  ;;  %2101 = vmatprep.subr.bf16.mxu0 %v3011_v52 }
 0x237   :  { %v673_v58 = vpop.f32.mrf.mxu1  ;;  %v714_v61 = vpop.f32.mrf.mxu0 }
 0x238   :  { %v674_v63 = vadd.f32 %v673_v58, %v282_v55  ;;  %v715_v1 = vadd.f32 %v714_v61, %v290_v59  ;;  %v3484_v55 = vsub.s32 5, %v3426_v50  ;;  %v3487_v59 = vsub.s32 7, %v3426_v50 }
 0x239   :  { %v675_v3 = vpop.f32.mrf.mxu1  ;;  %v716_v5 = vpop.f32.mrf.mxu0 }
 0x23a   :  { %v3453_v6 = vmax.f32 %v674_v63, 0.0  ;;  %v676_v7 = vadd.f32 %v675_v3, %v286_v62  ;;  %v3455_v10 = vmax.f32 %v715_v1, 0.0  ;;  %v717_v11 = vadd.f32 %v716_v5, %v294_v4 }
 0x23b   :  { %v677_v8 = vpop.f32.mrf.mxu1  ;;  %v718_v9 = vpop.f32.mrf.mxu0  ;;  %v298_v1 = vrot.slane %v3434_v54, %v3478_v46  ;;  %v306_v3 = vrot.slane %v3434_v54, %v3481_v47 }
 0x23c   :  { %v811_v14 = vrot.slane %v3453_v6, 4  ;;  %v868_v15 = vmul.f32 %v3453_v6, %v3453_v6  ;;  %v3460_v17 = vmax.f32 %v676_v7, 0.0  ;;  %v823_v19 = vrot.slane %v3455_v10, 4 }
 0x23d   :  { %v678_v12 = vpop.f32.mrf.mxu1  ;;  %v719_v13 = vpop.f32.mrf.mxu0  ;;  %v870_v20 = vmul.f32 %v3455_v10, %v3455_v10  ;;  %v3465_v21 = vmax.f32 %v717_v11, 0.0  ;;  %v302_v9 = vrot.slane %v3434_v54, %v3484_v55  ;;  %v310_v11 = vrot.slane %v3434_v54, %v3487_v59 }
 0x23e   :  { %v812_v22 = vadd.f32 %v811_v14, %v3453_v6  ;;  %v876_v24 = vrot.slane %v868_v15, 4  ;;  %v817_v0 = vrot.slane %v3460_v17, 4  ;;  %v824_v25 = vadd.f32 %v823_v19, %v3455_v10 }
 0x23f   :  { %v888_v26 = vrot.slane %v870_v20, 4  ;;  %v869_v27 = vmul.f32 %v3460_v17, %v3460_v17  ;;  %v829_v16 = vrot.slane %v3465_v21, 4  ;;  %v871_v29 = vmul.f32 %v3465_v21, %v3465_v21 }
 0x240   :  { %v813_v18 = vrot.slane %v812_v22, 2  ;;  %v877_v23 = vadd.f32 %v876_v24, %v868_v15  ;;  %v818_v28 = vadd.f32 %v817_v0, %v3460_v17  ;;  %v825_v30 = vrot.slane %v824_v25, 2 }
 0x241   :  { %v889_v31 = vadd.f32 %v888_v26, %v870_v20  ;;  %v882_v32 = vrot.slane %v869_v27, 4  ;;  %v830_v33 = vadd.f32 %v829_v16, %v3465_v21  ;;  %v894_v37 = vrot.slane %v871_v29, 4 }
 0x242   :  { %v814_v34 = vadd.f32 %v813_v18, %v812_v22  ;;  %v878_v35 = vrot.slane %v877_v23, 2  ;;  %v819_v36 = vrot.slane %v818_v28, 2  ;;  %v826_v38 = vadd.f32 %v825_v30, %v824_v25 }
 0x243   :  { %v890_v39 = vrot.slane %v889_v31, 2  ;;  %v883_v40 = vadd.f32 %v882_v32, %v869_v27  ;;  %v831_v41 = vrot.slane %v830_v33, 2  ;;  %v895_v45 = vadd.f32 %v894_v37, %v871_v29 }
 0x244   :  { %v815_v42 = vrot.slane %v814_v34, 1  ;;  %v879_v43 = vadd.f32 %v878_v35, %v877_v23  ;;  %v820_v44 = vadd.f32 %v819_v36, %v818_v28  ;;  %v827_v48 = vrot.slane %v826_v38, 1 }
 0x245   :  { %v891_v49 = vadd.f32 %v890_v39, %v889_v31  ;;  %v884_v51 = vrot.slane %v883_v40, 2  ;;  %v832_v52 = vadd.f32 %v831_v41, %v830_v33  ;;  %v896_v63 = vrot.slane %v895_v45, 2 }
 0x246   :  { %v816_v58 = vadd.f32 %v815_v42, %v814_v34  ;;  %v880_v61 = vrot.slane %v879_v43, 1  ;;  %v821_v62 = vrot.slane %v820_v44, 1  ;;  %v828_v4 = vadd.f32 %v827_v48, %v826_v38 }
 0x247   :  { %v892_v5 = vrot.slane %v891_v49, 1  ;;  %v885_v7 = vadd.f32 %v884_v51, %v883_v40  ;;  %v833_v8 = vrot.slane %v832_v52, 1  ;;  %v897_v15 = vadd.f32 %v896_v63, %v895_v45 }
 0x248   :  { %v3497_v12 = vmul.f32 0.125, %v816_v58  ;;  %v881_v13 = vadd.f32 %v880_v61, %v879_v43  ;;  %v822_v14 = vadd.f32 %v821_v62, %v820_v44  ;;  %v3499_v0 = vmul.f32 0.125, %v828_v4 }
 0x249   :  { %v3501_v25 = vadd.f32 %v892_v5, %v891_v49  ;;  %v886_v26 = vrot.slane %v885_v7, 1  ;;  %v834_v27 = vadd.f32 %v833_v8, %v832_v52  ;;  %v898_v33 = vrot.slane %v897_v15, 1 }
 0x24a   :  { %v3507_v30 = vmul.f32 0.125, %v881_v13  ;;  %v3511_v31 = vmul.f32 %v3497_v12, %v3497_v12  ;;  %v3513_v32 = vmul.f32 0.125, %v822_v14 }
 0x24b   :  { %v887_v40 = vadd.f32 %v886_v26, %v885_v7  ;;  %v3521_v41 = vmul.f32 0.125, %v834_v27  ;;  %v899_v58 = vadd.f32 %v898_v33, %v897_v15 }
 0x24c   :  { %v933_v13 = vmul.f32 %v3513_v32, %v3513_v32 }
 0x24d   :  { %v925_v7 = vmul.f32 0.125, %v887_v40  ;;  %v935_v27 = vmul.f32 %v3521_v41, %v3521_v41 }
 0x257   :  { %v755_v19 = vpop.f32.mrf.mxu1  ;;  %v796_v20 = vpop.f32.mrf.mxu0 }
 0x258   :  { %v756_v22 = vadd.f32 %v755_v19, %v298_v1  ;;  %v797_v24 = vadd.f32 %v796_v20, %v306_v3  ;;  %v927_v20 = vmul.f32 0.125, %v899_v58  ;;  %v934_v58 = vmul.f32 %v3499_v0, %v3499_v0 }
 0x259   :  { %v757_v16 = vpop.f32.mrf.mxu1  ;;  %v798_v18 = vpop.f32.mrf.mxu0 }
 0x25a   :  { %v3503_v23 = vmax.f32 %v756_v22, 0.0  ;;  %v3505_v54 = vmax.f32 %v797_v24, 0.0  ;;  %v758_v28 = vadd.f32 %v757_v16, %v302_v9  ;;  %v799_v29 = vadd.f32 %v798_v18, %v310_v11 }
 0x25b   :  { %v759_v34 = vpop.f32.mrf.mxu1  ;;  %v800_v35 = vpop.f32.mrf.mxu0 }
 0x25c   :  { %v835_v36 = vrot.slane %v3503_v23, 4  ;;  %v872_v37 = vmul.f32 %v3503_v23, %v3503_v23  ;;  %v847_v38 = vrot.slane %v3505_v54, 4  ;;  %v874_v39 = vmul.f32 %v3505_v54, %v3505_v54 }
 0x25d   :  { %v3523_v42 = vmax.f32 %v758_v28, 0.0  ;;  %v3525_v43 = vmax.f32 %v799_v29, 0.0  ;;  %v760_v44 = vpop.f32.mrf.mxu1  ;;  %v801_v45 = vpop.f32.mrf.mxu0 }
 0x25e   :  { %v836_v48 = vadd.f32 %v835_v36, %v3503_v23  ;;  %v900_v49 = vrot.slane %v872_v37, 4  ;;  %v848_v51 = vadd.f32 %v847_v38, %v3505_v54  ;;  %v912_v52 = vrot.slane %v874_v39, 4 }
 0x25f   :  { %v841_v61 = vrot.slane %v3523_v42, 4  ;;  %v873_v62 = vmul.f32 %v3523_v42, %v3523_v42  ;;  %v853_v63 = vrot.slane %v3525_v43, 4 }
 0x260   :  { %v837_v1 = vrot.slane %v836_v48, 2  ;;  %v901_v3 = vadd.f32 %v900_v49, %v872_v37  ;;  %v849_v4 = vrot.slane %v848_v51, 2  ;;  %v913_v5 = vadd.f32 %v912_v52, %v874_v39 }
 0x261   :  { %v842_v8 = vadd.f32 %v841_v61, %v3523_v42  ;;  %v906_v9 = vrot.slane %v873_v62, 4  ;;  %v854_v11 = vadd.f32 %v853_v63, %v3525_v43  ;;  %v875_v39 = vmul.f32 %v3525_v43, %v3525_v43 }
 0x262   :  { %v838_v14 = vadd.f32 %v837_v1, %v836_v48  ;;  %v902_v15 = vrot.slane %v901_v3, 2  ;;  %v850_v19 = vadd.f32 %v849_v4, %v848_v51  ;;  %v914_v22 = vrot.slane %v913_v5, 2 }
 0x263   :  { %v843_v24 = vrot.slane %v842_v8, 2  ;;  %v907_v26 = vadd.f32 %v906_v9, %v873_v62  ;;  %v855_v35 = vrot.slane %v854_v11, 2  ;;  %v926_v49 = vmul.f32 0.125, %v3501_v25 }
 0x264   :  { %v839_v16 = vrot.slane %v838_v14, 1  ;;  %v903_v18 = vadd.f32 %v902_v15, %v901_v3  ;;  %v851_v28 = vrot.slane %v850_v19, 1  ;;  %v915_v29 = vadd.f32 %v914_v22, %v913_v5 }
 0x265   :  { %v844_v33 = vadd.f32 %v843_v24, %v842_v8  ;;  %v908_v34 = vrot.slane %v907_v26, 2  ;;  %v856_v48 = vadd.f32 %v855_v35, %v854_v11  ;;  %v940_v1 = vsub.f32 %v3507_v30, %v3511_v31 }
 0x266   :  { %v840_v36 = vadd.f32 %v839_v16, %v838_v14  ;;  %v904_v37 = vrot.slane %v903_v18, 1  ;;  %v852_v38 = vadd.f32 %v851_v28, %v850_v19  ;;  %v916_v40 = vrot.slane %v915_v29, 1 }
 0x267   :  { %v845_v44 = vrot.slane %v844_v33, 1  ;;  %v909_v45 = vadd.f32 %v908_v34, %v907_v26  ;;  %v857_v63 = vrot.slane %v856_v48, 1  ;;  %v941_v3 = vsub.f32 %v925_v7, %v933_v13 }
 0x268   :  { %v3542_v51 = vmul.f32 0.125, %v840_v36  ;;  %v905_v52 = vadd.f32 %v904_v37, %v903_v18  ;;  %v943_v4 = vsub.f32 %v927_v20, %v935_v27  ;;  %v918_v5 = vrot.slane %v875_v39, 4 }
 0x269   :  { %v846_v61 = vadd.f32 %v845_v44, %v844_v33  ;;  %v910_v62 = vrot.slane %v909_v45, 1  ;;  %v3548_v8 = vmul.f32 0.125, %v852_v38  ;;  %v917_v9 = vadd.f32 %v916_v40, %v915_v29 }
 0x26a   :  { %v928_v14 = vmul.f32 0.125, %v905_v52  ;;  %v936_v15 = vmul.f32 %v3542_v51, %v3542_v51  ;;  %v858_v19 = vadd.f32 %v857_v63, %v856_v48  ;;  %v919_v22 = vadd.f32 %v918_v5, %v875_v39 }
 0x26b   :  { %v3550_v11 = vmul.f32 0.125, %v846_v61  ;;  %v911_v25 = vadd.f32 %v910_v62, %v909_v45  ;;  %v942_v24 = vsub.f32 %v926_v49, %v934_v58  ;;  %v949_v31 = vadd.f32 1e-05, %v940_v1 }
 0x26c   :  { %v920_v7 = vrot.slane %v919_v22, 2  ;;  %v950_v13 = vadd.f32 1e-05, %v941_v3  ;;  %v930_v20 = vmul.f32 0.125, %v917_v9  ;;  %v938_v27 = vmul.f32 %v3548_v8, %v3548_v8 }
 0x26d   :  { %v929_v26 = vmul.f32 0.125, %v911_v25  ;;  %v937_v30 = vmul.f32 %v3550_v11, %v3550_v11  ;;  %v952_v18 = vadd.f32 1e-05, %v943_v4  ;;  %v944_v28 = vsub.f32 %v928_v14, %v936_v15 }
 0x26e   :  { %v867_v29 = vmul.f32 0.125, %v858_v19  ;;  %v921_v33 = vadd.f32 %v920_v7, %v919_v22  ;;  %v951_v34 = vadd.f32 1e-05, %v942_v24  ;;  %3122 = vrsqrt.f32 %v949_v31 }
 0x26f   :  { %v945_v16 = vsub.f32 %v929_v26, %v937_v30  ;;  %3124 = vrsqrt.f32 %v950_v13  ;;  %v946_v37 = vsub.f32 %v930_v20, %v938_v27  ;;  %v953_v38 = vadd.f32 1e-05, %v944_v28 }
 0x270   :  { %v922_v36 = vrot.slane %v921_v33, 1  ;;  %3126 = vrsqrt.f32 %v952_v18  ;;  %v939_v40 = vmul.f32 %v867_v29, %v867_v29  ;;  %v3227_v52 = vmov 1966171168  }
 0x271   :  { %v954_v35 = vadd.f32 1e-05, %v945_v16  ;;  %3128 = vrsqrt.f32 %v951_v34  ;;  %v955_v45 = vadd.f32 1e-05, %v946_v37  ;;  %v978_v58 = vunpack.c.l.s4 %v3227_v52  ;;  %v948_v16 = vld [vmem:[%s3728_s5] sm:$0xff] }
 0x272   :  { %v923_v39 = vadd.f32 %v922_v36, %v921_v33 }
 0x273   :  { %3130 = vrsqrt.f32 %v954_v35  ;;  %v979_v63 = vunpack.c.0.s8 %v978_v58 }
 0x274   :  { %v931_v44 = vmul.f32 0.125, %v923_v39  ;;  %3132 = vrsqrt.f32 %v953_v38 }
 0x275   :  { %3134 = vrsqrt.f32 %v955_v45  ;;  %v3559_v5 = vsub.s32 %v979_v63, %v3426_v50 }
 0x276   :  { %v947_v48 = vsub.f32 %v931_v44, %v939_v40 }
 0x278   :  { %v956_v49 = vadd.f32 1e-05, %v947_v48 }
 0x27a   :  { %3136 = vrsqrt.f32 %v956_v49 }
 0x27b   :  { %v3123_v61 = vpop.eup %3122 }
 0x27c   :  { %v3125_v62 = vpop.eup %3124 }
 0x27d   :  { %v3127_v1 = vpop.eup %3126  ;;  %v973_v9 = vcombine.low %v3123_v61, %v3125_v62 }
 0x27e   :  { %v3129_v3 = vpop.eup %3128 }
 0x27f   :  { %v974_v25 = vcombine.low %v3129_v3, %v3127_v1  ;;  %v983_v22 = vrot.slane %v973_v9, %v3559_v5 }
 0x280   :  { %v3131_v4 = vpop.eup %3130 }
 0x281   :  { %v3133_v14 = vpop.eup %3132  ;;  %v990_v24 = vrot.slane %v974_v25, %v3559_v5 }
 0x282   :  { %v975_v15 = vcombine.low %v3133_v14, %v3131_v4  ;;  %v3135_v19 = vpop.eup %3134 }
 0x283   :  { %v1005_v7 = vcombine.low %v983_v22, %v990_v24 }
 0x284   :  { %v997_v30 = vrot.slane %v975_v15, %v3559_v5 }
 0x285   :  { %v1013_v50 = vrot.slane %v1005_v7, %v3559_v5 }
 0x287   :  { %v3137_v26 = vpop.eup %3136 }
 0x288   :  { %v976_v31 = vcombine.low %v3135_v19, %v3137_v26 }
 0x28a   :  { %v1004_v13 = vrot.slane %v976_v31, %v3559_v5 }
 0x28c   :  { %v1006_v20 = vcombine.low %v997_v30, %v1004_v13 }
 0x28e   :  { %v1020_v27 = vrot.slane %v1006_v20, %v3559_v5 }
 0x290   :  { %v1021_v18 = vcombine.low %v1013_v50, %v1020_v27 }
 0x292   :  { %v1023_v28 = vmul.f32 %v1021_v18, %v948_v16 }
 0x294   :  { %v1045_v33 = vrot.slane %v1023_v28, %v3478_v46  ;;  %v1049_v34 = vrot.slane %v1023_v28, %v3484_v55  ;;  %v1053_v35 = vrot.slane %v1023_v28, %v3481_v47  ;;  %v1057_v36 = vrot.slane %v1023_v28, %v3487_v59 }
 0x295   :  { %v1029_v37 = vrot.slane %v1023_v28, %v3429_v53  ;;  %v1033_v38 = vrot.slane %v1023_v28, %v3440_v57  ;;  %v1037_v39 = vrot.slane %v1023_v28, %v3437_v56  ;;  %v1041_v40 = vrot.slane %v1023_v28, %v3447_v60 }
 0x296   :  { %v1070_v44 = vmul.f32 %v1045_v33, %v3542_v51  ;;  %v1071_v45 = vmul.f32 %v1049_v34, %v3550_v11  ;;  %v1072_v48 = vmul.f32 %v1053_v35, %v3548_v8  ;;  %v1073_v49 = vmul.f32 %v1057_v36, %v867_v29 }
 0x297   :  { %v1066_v52 = vmul.f32 %v1029_v37, %v3497_v12  ;;  %v1067_v58 = vmul.f32 %v1033_v38, %v3513_v32  ;;  %v1068_v61 = vmul.f32 %v1037_v39, %v3499_v0  ;;  %v1069_v62 = vmul.f32 %v1041_v40, %v3521_v41  ;;  %v1024_v41 = vld [vmem:[%s3729_s6] sm:$0xff] }
 0x298   :  { %v1084_v63 = vcombine.low %v1070_v44, %v1071_v45  ;;  %v1085_v1 = vcombine.low %v1072_v48, %v1073_v49  ;;  %v1134_v14 = vmul.f32 %v1033_v38, %v3460_v17  ;;  %v1136_v19 = vmul.f32 %v1041_v40, %v3465_v21  ;;  %v3012_v38 = vld [vmem:[#allocation5 + $0x260] ss:$8 sps:$4 sm:$0xff]   ;;  %v3020_v40 = vld [vmem:[#allocation5 + $0x254] ss:$8 sps:$4 sm:$0xff]   ;;  %v3018_v45 = vld [vmem:[#allocation5 + $0x250] ss:$8 sps:$4 sm:$0xff]  }
 0x299   :  { %v1082_v3 = vcombine.low %v1066_v52, %v1067_v58  ;;  %v1083_v4 = vcombine.low %v1068_v61, %v1069_v62  ;;  %v1133_v22 = vmul.f32 %v1029_v37, %v3453_v6  ;;  %v1135_v24 = vmul.f32 %v1037_v39, %v3455_v10  ;;  %v3015_v39 = vld [vmem:[#allocation5 + $0x360] ss:$8 sps:$4 sm:$0xff]   ;;  %v3023_v44 = vld [vmem:[#allocation5 + $0x354] ss:$8 sps:$4 sm:$0xff]   ;;  %v3021_v48 = vld [vmem:[#allocation5 + $0x350] ss:$8 sps:$4 sm:$0xff]  }
 0x29a   :  { %v1106_v9 = vrot.slane %v1084_v63, %v3559_v5  ;;  %v1113_v51 = vrot.slane %v1085_v1, %v3559_v5  ;;  %v1138_v26 = vmul.f32 %v1049_v34, %v3523_v42  ;;  %v1140_v30 = vmul.f32 %v1057_v36, %v3525_v43  ;;  %v3006_v34 = vld [vmem:[#allocation5 + $0x270] ss:$8 sps:$4 sm:$0xff]   ;;  %v3026_v49 = vld [vmem:[#allocation5 + $0x244] ss:$8 sps:$4 sm:$0xff]   ;;  %v3024_v58 = vld [vmem:[#allocation5 + $0x240] ss:$8 sps:$4 sm:$0xff]  }
 0x29b   :  { %v1092_v11 = vrot.slane %v1082_v3, %v3559_v5  ;;  %v1099_v8 = vrot.slane %v1083_v4, %v3559_v5  ;;  %v1137_v31 = vmul.f32 %v1045_v33, %v3503_v23  ;;  %v1139_v7 = vmul.f32 %v1053_v35, %v3505_v54  ;;  %v3029_v52 = vld [vmem:[#allocation5 + $0x344] ss:$8 sps:$4 sm:$0xff]   ;;  %v3027_v61 = vld [vmem:[#allocation5 + $0x340] ss:$8 sps:$4 sm:$0xff]   ;;  %v3032_v62 = vld [vmem:[#allocation5 + $0x234] ss:$8 sps:$4 sm:$0xff]  }
 0x29c   :  { %v1115_v29 = vcombine.low %v1106_v9, %v1113_v51  ;;  %v3035_v63 = vld [vmem:[#allocation5 + $0x334] ss:$8 sps:$4 sm:$0xff]   ;;  %v3030_v1 = vld [vmem:[#allocation5 + $0x230] ss:$8 sps:$4 sm:$0xff]   ;;  %v3038_v4 = vld [vmem:[#allocation5 + $0x224] ss:$8 sps:$4 sm:$0xff]  }
 0x29d   :  { %v1114_v12 = vcombine.low %v1092_v11, %v1099_v8  ;;  %v3033_v3 = vld [vmem:[#allocation5 + $0x330] ss:$8 sps:$4 sm:$0xff]   ;;  %v3041_v9 = vld [vmem:[#allocation5 + $0x324] ss:$8 sps:$4 sm:$0xff]   ;;  %v3036_v51 = vld [vmem:[#allocation5 + $0x220] ss:$8 sps:$4 sm:$0xff]  }
 0x29e   :  { %v1129_v32 = vrot.slane %v1115_v29, %v3559_v5  ;;  %v3039_v11 = vld [vmem:[#allocation5 + $0x320] ss:$8 sps:$4 sm:$0xff]   ;;  %v3044_v8 = vld [vmem:[#allocation5 + $0x214] ss:$8 sps:$4 sm:$0xff]  }
 0x29f   :  { %v1122_v0 = vrot.slane %v1114_v12, %v3559_v5  ;;  %v3047_v29 = vld [vmem:[#allocation5 + $0x314] ss:$8 sps:$4 sm:$0xff]   ;;  %v3042_v12 = vld [vmem:[#allocation5 + $0x210] ss:$8 sps:$4 sm:$0xff]  }
 0x2a1   :  { %v1130_v25 = vcombine.low %v1122_v0, %v1129_v32  ;;  %v3045_v32 = vld [vmem:[#allocation5 + $0x310] ss:$8 sps:$4 sm:$0xff]   ;;  %v3050_v0 = vld [vmem:[#allocation5 + $0x204] ss:$8 sps:$4 sm:$0xff]  }
 0x2a3   :  { %v1132_v15 = vsub.f32 %v1024_v41, %v1130_v25  ;;  %v3053_v41 = vld [vmem:[#allocation5 + $0x304] ss:$8 sps:$4 sm:$0xff]   ;;  %v3048_v25 = vld [vmem:[#allocation5 + $0x200] ss:$8 sps:$4 sm:$0xff]  }
 0x2a5   :  { %v1149_v13 = vrot.slane %v1132_v15, %v3440_v57  ;;  %v1157_v20 = vrot.slane %v1132_v15, %v3447_v60  ;;  %v1145_v17 = vrot.slane %v1132_v15, %v3429_v53  ;;  %v1153_v21 = vrot.slane %v1132_v15, %v3437_v56 }
 0x2a6   :  { %v1165_v6 = vrot.slane %v1132_v15, %v3484_v55  ;;  %v1173_v10 = vrot.slane %v1132_v15, %v3487_v59  ;;  %v1161_v42 = vrot.slane %v1132_v15, %v3478_v46  ;;  %v1169_v43 = vrot.slane %v1132_v15, %v3481_v47  ;;  %v3009_v55 = vld [vmem:[#allocation5 + $0x370] ss:$8 sps:$4 sm:$0xff]   ;;  %v3014_v46 = vld [vmem:[#allocation5 + $0x264] ss:$8 sps:$4 sm:$0xff]   ;;  %v3056_v15 = vld [vmem:[#allocation5 + $0x2f4] ss:$8 sps:$4 sm:$0xff]  }
 0x2a7   :  { %v1183_v50 = vadd.f32 %v1149_v13, %v1134_v14  ;;  %v1185_v23 = vadd.f32 %v1157_v20, %v1136_v19  ;;  %v1182_v27 = vadd.f32 %v1145_v17, %v1133_v22  ;;  %v1184_v54 = vadd.f32 %v1153_v21, %v1135_v24  ;;  %v3017_v47 = vld [vmem:[#allocation5 + $0x364] ss:$8 sps:$4 sm:$0xff]   ;;  %v3051_v14 = vld [vmem:[#allocation5 + $0x300] ss:$8 sps:$4 sm:$0xff]   ;;  %v3059_v19 = vld [vmem:[#allocation5 + $0x3f4] ss:$8 sps:$4 sm:$0xff]  }
 0x2a8   :  { %v1187_v16 = vadd.f32 %v1165_v6, %v1138_v26  ;;  %v1189_v18 = vadd.f32 %v1173_v10, %v1140_v30  ;;  %v3610_v28 = vadd.f32 %v1161_v42, %v1137_v31  ;;  %v3612_v60 = vadd.f32 %v1169_v43, %v1139_v7  ;;  %v3054_v22 = vld [vmem:[#allocation5 + $0x2f0] ss:$8 sps:$4 sm:$0xff]   ;;  %v3062_v26 = vld [vmem:[#allocation5 + $0x2e4] ss:$8 sps:$4 sm:$0xff]   ;;  %v3060_v31 = vld [vmem:[#allocation5 + $0x2e0] ss:$8 sps:$4 sm:$0xff]  }
 0x2a9   :  { %v1191_v33 = vpack.c.bf16 %v1183_v50, %v1183_v50  ;;  %v1193_v56 = vpack.c.bf16 %v1185_v23, %v1185_v23  ;;  %v1190_v35 = vpack.c.bf16 %v1182_v27, %v1182_v27  ;;  %v1192_v59 = vpack.c.bf16 %v1184_v54, %v1184_v54  ;;  %v3057_v24 = vld [vmem:[#allocation5 + $0x3f0] ss:$8 sps:$4 sm:$0xff]   ;;  %v3065_v30 = vld [vmem:[#allocation5 + $0x3e4] ss:$8 sps:$4 sm:$0xff]   ;;  %v3063_v7 = vld [vmem:[#allocation5 + $0x3e0] ss:$8 sps:$4 sm:$0xff]  }
 0x2aa   :  { %v1195_v36 = vpack.c.bf16 %v1187_v16, %v1187_v16  ;;  %v1197_v37 = vpack.c.bf16 %v1189_v18, %v1189_v18  ;;  %v3068_v13 = vld [vmem:[#allocation5 + $0x2d4] ss:$8 sps:$4 sm:$0xff]   ;;  %v3066_v17 = vld [vmem:[#allocation5 + $0x2d0] ss:$8 sps:$4 sm:$0xff]   ;;  %v3074_v6 = vld [vmem:[#allocation5 + $0x2c4] ss:$8 sps:$4 sm:$0xff]  }
 0x2ab   :  { %2010 = vmatprep.mubr.bf16.mxu1 %v1191_v33  ;;  %2051 = vmatprep.mubr.bf16.mxu0 %v1193_v56  ;;  %v3071_v20 = vld [vmem:[#allocation5 + $0x3d4] ss:$8 sps:$4 sm:$0xff]   ;;  %v3069_v21 = vld [vmem:[#allocation5 + $0x3d0] ss:$8 sps:$4 sm:$0xff]   ;;  %v3077_v10 = vld [vmem:[#allocation5 + $0x3c4] ss:$8 sps:$4 sm:$0xff]  }
 0x2ac   :  { %2011 = vmatmul.mubr.bf16.vlgmr.msra.gmra.mxu1 %v1190_v35  ;;  %2052 = vmatmul.mubr.bf16.vlgmr.msra.gmra.mxu0 %v1192_v59  ;;  %v3072_v42 = vld [vmem:[#allocation5 + $0x2c0] ss:$8 sps:$4 sm:$0xff]   ;;  %v3080_v50 = vld [vmem:[#allocation5 + $0x2b4] ss:$8 sps:$4 sm:$0xff]   ;;  %v3078_v27 = vld [vmem:[#allocation5 + $0x2b0] ss:$8 sps:$4 sm:$0xff]  }
 0x2ad   :  { %2061 = vmatpush1.bf16.msra.mxu1 %v3006_v34  ;;  %2102 = vmatpush1.bf16.msra.mxu0 %v3009_v55  ;;  %v3075_v43 = vld [vmem:[#allocation5 + $0x3c0] ss:$8 sps:$4 sm:$0xff]   ;;  %v3083_v23 = vld [vmem:[#allocation5 + $0x3b4] ss:$8 sps:$4 sm:$0xff]   ;;  %v3081_v54 = vld [vmem:[#allocation5 + $0x3b0] ss:$8 sps:$4 sm:$0xff]  }
 0x2ae   :  { %2092 = vmatprep.mubr.bf16.mxu1 %v1195_v36  ;;  %2133 = vmatprep.mubr.bf16.mxu0 %v1197_v37  ;;  %v3086_v16 = vld [vmem:[#allocation5 + $0x2a4] ss:$8 sps:$4 sm:$0xff]   ;;  %v3084_v33 = vld [vmem:[#allocation5 + $0x2a0] ss:$8 sps:$4 sm:$0xff]   ;;  %v3092_v34 = vld [vmem:[#allocation5 + $0x294] ss:$8 sps:$4 sm:$0xff]  }
 0x2af   :  { %2062 = vmatprep.subr.bf16.mxu1 %v3014_v46  ;;  %2103 = vmatprep.subr.bf16.mxu0 %v3017_v47  ;;  %v3089_v18 = vld [vmem:[#allocation5 + $0x3a4] ss:$8 sps:$4 sm:$0xff]   ;;  %v3087_v56 = vld [vmem:[#allocation5 + $0x3a0] ss:$8 sps:$4 sm:$0xff]   ;;  %v3095_v55 = vld [vmem:[#allocation5 + $0x394] ss:$8 sps:$4 sm:$0xff]  }
 0x2b0   :  { %v3090_v35 = vld [vmem:[#allocation5 + $0x290] ss:$8 sps:$4 sm:$0xff]   ;;  %v3098_v46 = vld [vmem:[#allocation5 + $0x284] ss:$8 sps:$4 sm:$0xff]   ;;  %v3096_v36 = vld [vmem:[#allocation5 + $0x280] ss:$8 sps:$4 sm:$0xff]  }
 0x2b1   :  { %2063 = vmatpush1.bf16.msra.mxu1 %v3012_v38  ;;  %2104 = vmatpush1.bf16.msra.mxu0 %v3015_v39  ;;  %v3093_v59 = vld [vmem:[#allocation5 + $0x390] ss:$8 sps:$4 sm:$0xff]   ;;  %v3101_v47 = vld [vmem:[#allocation5 + $0x384] ss:$8 sps:$4 sm:$0xff]   ;;  %v3099_v37 = vld [vmem:[#allocation5 + $0x380] ss:$8 sps:$4 sm:$0xff]   ;;  %v1194_v38 = vpack.c.bf16 %v3610_v28, %v3610_v28  ;;  %v1196_v39 = vpack.c.bf16 %v3612_v60, %v3612_v60 }
 0x2b2   :  { %2064 = vmatprep.subr.bf16.mxu1 %v3020_v40  ;;  %2105 = vmatprep.subr.bf16.mxu0 %v3023_v44  ;;  %v3102_v40 = vld [vmem:[%s3734_s11 + $0x78] sm:$0xff]   ;;  %v3104_v28 = vld [vmem:[%s3734_s11 + $0x70] sm:$0xff]  }
 0x2b3   :  { %v3103_v44 = vld [vmem:[%s3734_s11 + $0x38] sm:$0xff]   ;;  %v3105_v60 = vld [vmem:[%s3734_s11 + $0x30] sm:$0xff]  }
 0x2b5   :  { %2065 = vmatpush1.bf16.msra.mxu1 %v3018_v45  ;;  %2106 = vmatpush1.bf16.msra.mxu0 %v3021_v48  ;;  %v3106_v45 = vld [vmem:[%s3734_s11 + $0x68] sm:$0xff]  }
 0x2b6   :  { %2066 = vmatprep.subr.bf16.mxu1 %v3026_v49  ;;  %2107 = vmatprep.subr.bf16.mxu0 %v3029_v52  ;;  %v3107_v48 = vld [vmem:[%s3734_s11 + $0x28] sm:$0xff]   ;;  %v3108_v49 = vld [vmem:[%s3734_s11 + $0x60] sm:$0xff]  }
 0x2b7   :  { %v3109_v52 = vld [vmem:[%s3734_s11 + $0x20] sm:$0xff]  }
 0x2b9   :  { %2067 = vmatpush1.bf16.msra.mxu1 %v3024_v58  ;;  %2108 = vmatpush1.bf16.msra.mxu0 %v3027_v61  ;;  %v3110_v58 = vld [vmem:[%s3734_s11 + $0x58] sm:$0xff]  }
 0x2ba   :  { %2068 = vmatprep.subr.bf16.mxu1 %v3032_v62  ;;  %2109 = vmatprep.subr.bf16.mxu0 %v3035_v63  ;;  %v3111_v61 = vld [vmem:[%s3734_s11 + $0x18] sm:$0xff]   ;;  %v3112_v62 = vld [vmem:[%s3734_s11 + $0x50] sm:$0xff]  }
 0x2bb   :  { %v3113_v63 = vld [vmem:[%s3734_s11 + $0x10] sm:$0xff]  }
 0x2bd   :  { %2069 = vmatpush1.bf16.msra.mxu1 %v3030_v1  ;;  %2110 = vmatpush1.bf16.msra.mxu0 %v3033_v3  ;;  %v3114_v1 = vld [vmem:[%s3734_s11 + $0x48] sm:$0xff]  }
 0x2be   :  { %2070 = vmatprep.subr.bf16.mxu1 %v3038_v4  ;;  %2111 = vmatprep.subr.bf16.mxu0 %v3041_v9  ;;  %v3115_v3 = vld [vmem:[%s3734_s11 + $0x8] sm:$0xff]   ;;  %v3116_v4 = vld [vmem:[%s3734_s11 + $0x40] sm:$0xff]  }
 0x2bf   :  { %v3117_v9 = vld [vmem:[%s3734_s11] sm:$0xff]  }
 0x2c1   :  { %2071 = vmatpush1.bf16.msra.mxu1 %v3036_v51  ;;  %2112 = vmatpush1.bf16.msra.mxu0 %v3039_v11 }
 0x2c2   :  { %2072 = vmatprep.subr.bf16.mxu1 %v3044_v8  ;;  %2113 = vmatprep.subr.bf16.mxu0 %v3047_v29 }
 0x2c5   :  { %2073 = vmatpush1.bf16.msra.mxu1 %v3042_v12  ;;  %2114 = vmatpush1.bf16.msra.mxu0 %v3045_v32 }
 0x2c6   :  { %2074 = vmatprep.subr.bf16.mxu1 %v3050_v0  ;;  %2115 = vmatprep.subr.bf16.mxu0 %v3053_v41 }
 0x2c9   :  { %2075 = vmatpush1.bf16.msra.mxu1 %v3048_v25  ;;  %2116 = vmatpush1.bf16.msra.mxu0 %v3051_v14  ;;  %v1326_v25 = vld [vmem:[%s3731_s8] sm:$0x3] }
 0x2ca   :  { %2076 = vmatprep.subr.bf16.mxu1 %v3056_v15  ;;  %2117 = vmatprep.subr.bf16.mxu0 %v3059_v19  ;;  %v1331_v14 = vrot.slane %v1326_v25, %v3429_v53  ;;  %v1335_v15 = vrot.slane %v1326_v25, %v3440_v57 }
 0x2cd   :  { %2077 = vmatpush2.bf16.msra.mxu1 %v3054_v22  ;;  %2118 = vmatpush2.bf16.msra.mxu0 %v3057_v24 }
 0x2ce   :  { %2078 = vmatprep.subr.bf16.mxu1 %v3062_v26  ;;  %2119 = vmatprep.subr.bf16.mxu0 %v3065_v30 }
 0x2d1   :  { %2079 = vmatpush2.bf16.msra.mxu1 %v3060_v31  ;;  %2120 = vmatpush2.bf16.msra.mxu0 %v3063_v7 }
 0x2d2   :  { %2080 = vmatprep.subr.bf16.mxu1 %v3068_v13  ;;  %2121 = vmatprep.subr.bf16.mxu0 %v3071_v20 }
 0x2d5   :  { %2081 = vmatpush2.bf16.msra.mxu1 %v3066_v17  ;;  %2122 = vmatpush2.bf16.msra.mxu0 %v3069_v21 }
 0x2d6   :  { %2082 = vmatprep.subr.bf16.mxu1 %v3074_v6  ;;  %2123 = vmatprep.subr.bf16.mxu0 %v3077_v10 }
 0x2d9   :  { %2083 = vmatpush2.bf16.msra.mxu1 %v3072_v42  ;;  %2124 = vmatpush2.bf16.msra.mxu0 %v3075_v43 }
 0x2da   :  { %2084 = vmatprep.subr.bf16.mxu1 %v3080_v50  ;;  %2125 = vmatprep.subr.bf16.mxu0 %v3083_v23 }
 0x2dd   :  { %2085 = vmatpush2.bf16.msra.mxu1 %v3078_v27  ;;  %2126 = vmatpush2.bf16.msra.mxu0 %v3081_v54 }
 0x2de   :  { %2086 = vmatprep.subr.bf16.mxu1 %v3086_v16  ;;  %2127 = vmatprep.subr.bf16.mxu0 %v3089_v18 }
 0x2e1   :  { %2087 = vmatpush2.bf16.msra.mxu1 %v3084_v33  ;;  %2128 = vmatpush2.bf16.msra.mxu0 %v3087_v56 }
 0x2e2   :  { %2088 = vmatprep.subr.bf16.mxu1 %v3092_v34  ;;  %2129 = vmatprep.subr.bf16.mxu0 %v3095_v55 }
 0x2e5   :  { %2089 = vmatpush2.bf16.msra.mxu1 %v3090_v35  ;;  %2130 = vmatpush2.bf16.msra.mxu0 %v3093_v59 }
 0x2e6   :  { %2090 = vmatprep.subr.bf16.mxu1 %v3098_v46  ;;  %2131 = vmatprep.subr.bf16.mxu0 %v3101_v47 }
 0x2e9   :  { %2091 = vmatpush2.bf16.msra.mxu1 %v3096_v36  ;;  %2132 = vmatpush2.bf16.msra.mxu0 %v3099_v37 }
 0x2ea   :  { %2877 = vmatprep.subr.bf16.mxu0 %v3222_v2  ;;  %2815 = vmatprep.subr.bf16.mxu1 %v3102_v40 }
 0x2ec   :  { %2093 = vmatmul.mubr.bf16.vlgmr.msra.gmra.mxu1 %v1194_v38  ;;  %2134 = vmatmul.mubr.bf16.vlgmr.msra.gmra.mxu0 %v1196_v39 }
 0x2ed   :  { %2885 = vmatprep.mubr.msk.bf16.mxu0 %vm3226_vm0, %v3222_v2  ;;  %2816 = vmatpush3.bf16.msra.mxu1 %v3103_v44 }
 0x2ee   :  { %2817 = vmatprep.subr.bf16.mxu1 %v3104_v28 }
 0x2f1   :  { %2818 = vmatpush3.bf16.msra.mxu1 %v3105_v60 }
 0x2f2   :  { %2819 = vmatprep.subr.bf16.mxu1 %v3106_v45 }
 0x2f5   :  { %2820 = vmatpush3.bf16.msra.mxu1 %v3107_v48 }
 0x2f6   :  { %2821 = vmatprep.subr.bf16.mxu1 %v3108_v49 }
 0x2f9   :  { %2822 = vmatpush3.bf16.msra.mxu1 %v3109_v52 }
 0x2fa   :  { %2823 = vmatprep.subr.bf16.mxu1 %v3110_v58 }
 0x2fd   :  { %2824 = vmatpush3.bf16.msra.mxu1 %v3111_v61 }
 0x2fe   :  { %2825 = vmatprep.subr.bf16.mxu1 %v3112_v62 }
 0x301   :  { %2826 = vmatpush3.bf16.msra.mxu1 %v3113_v63 }
 0x302   :  { %2827 = vmatprep.subr.bf16.mxu1 %v3114_v1 }
 0x305   :  { %2828 = vmatpush3.bf16.msra.mxu1 %v3115_v3 }
 0x306   :  { %2829 = vmatprep.subr.bf16.mxu1 %v3116_v4 }
 0x309   :  { %2830 = vmatpush3.bf16.msra.mxu1 %v3117_v9 }
 0x36c   :  { %v2012_v51 = vpop.f32.mrf.mxu1  ;;  %v2053_v11 = vpop.f32.mrf.mxu0 }
 0x36d   :  { %v2013_v19 = vadd.f32 %v2012_v51, %v1331_v14  ;;  %v2178_v14 = vld [vmem:[%s3732_s9] sm:$0x3] }
 0x36e   :  { %v2014_v8 = vpop.f32.mrf.mxu1  ;;  %v2055_v29 = vpop.f32.mrf.mxu0 }
 0x36f   :  { %v2015_v22 = vadd.f32 %v2014_v8, %v1335_v15  ;;  %v2054_v24 = vadd.f32 %v2053_v11, %v2013_v19 }
 0x370   :  { %v2016_v12 = vpop.f32.mrf.mxu1  ;;  %v2057_v32 = vpop.f32.mrf.mxu0 }
 0x371   :  { %v2056_v31 = vadd.f32 %v2055_v29, %v2015_v22 }
 0x372   :  { %v2017_v0 = vpop.f32.mrf.mxu1  ;;  %v2058_v41 = vpop.f32.mrf.mxu0 }
 0x3ac   :  { %v2094_v26 = vpop.f32.mrf.mxu1  ;;  %v2135_v30 = vpop.f32.mrf.mxu0 }
 0x3ad   :  { %v2095_v7 = vadd.f32 %v2094_v26, %v2054_v24 }
 0x3ae   :  { %v2096_v13 = vpop.f32.mrf.mxu1  ;;  %v2137_v20 = vpop.f32.mrf.mxu0 }
 0x3af   :  { %v2136_v17 = vadd.f32 %v2135_v30, %v2095_v7  ;;  %v2097_v21 = vadd.f32 %v2096_v13, %v2056_v31  ;;  %v2202_v13 = vld [vmem:[%s3733_s10] sm:$0x3] }
 0x3b0   :  { %v2098_v6 = vpop.f32.mrf.mxu1  ;;  %v2139_v10 = vpop.f32.mrf.mxu0 }
 0x3b1   :  { %v2142_v42 = vmax.f32 %v2136_v17, 0.0  ;;  %v2138_v43 = vadd.f32 %v2137_v20, %v2097_v21 }
 0x3b2   :  { %v2099_v50 = vpop.f32.mrf.mxu1  ;;  %v2140_v23 = vpop.f32.mrf.mxu0 }
 0x3b3   :  { %v2144_v27 = vrot.slane %v2142_v42, 4  ;;  %v2158_v54 = vmul.f32 %v2142_v42, %v2142_v42  ;;  %v2143_v16 = vmax.f32 %v2138_v43, 0.0 }
 0x3b5   :  { %v2145_v18 = vadd.f32 %v2144_v27, %v2142_v42  ;;  %v2160_v33 = vrot.slane %v2158_v54, 4  ;;  %v2150_v56 = vrot.slane %v2143_v16, 4  ;;  %v2159_v34 = vmul.f32 %v2143_v16, %v2143_v16 }
 0x3b7   :  { %v2146_v55 = vrot.slane %v2145_v18, 2  ;;  %v2161_v35 = vadd.f32 %v2160_v33, %v2158_v54  ;;  %v2151_v59 = vadd.f32 %v2150_v56, %v2143_v16  ;;  %v2166_v46 = vrot.slane %v2159_v34, 4  ;;  %v2775_v33 = vld [vmem:[%s3735_s12] ss:$0 sm:$0xff] }
 0x3b9   :  { %v2147_v47 = vadd.f32 %v2146_v55, %v2145_v18  ;;  %v2162_v36 = vrot.slane %v2161_v35, 2  ;;  %v2152_v37 = vrot.slane %v2151_v59, 2  ;;  %v2167_v38 = vadd.f32 %v2166_v46, %v2159_v34  ;;  %v3118_v18 = vld [vmem:[%s3738_s15 + $0x18] sm:$0xff]  }
 0x3ba   :  { %2878 = vmatpush3.bf16.msra.mxu0 %v3118_v18 }
 0x3bb   :  { %v2148_v39 = vrot.slane %v2147_v47, 1  ;;  %v2163_v40 = vadd.f32 %v2162_v36, %v2161_v35  ;;  %v2153_v44 = vadd.f32 %v2152_v37, %v2151_v59  ;;  %v2168_v28 = vrot.slane %v2167_v38, 2  ;;  %2879 = vmatprep.subr.bf16.mxu0 %v3222_v2 }
 0x3bd   :  { %v2149_v60 = vadd.f32 %v2148_v39, %v2147_v47  ;;  %v2164_v45 = vrot.slane %v2163_v40, 1  ;;  %v2154_v48 = vrot.slane %v2153_v44, 1  ;;  %v2169_v49 = vadd.f32 %v2168_v28, %v2167_v38 }
 0x3bf   :  { %v2156_v52 = vmul.f32 0.125, %v2149_v60  ;;  %v2165_v58 = vadd.f32 %v2164_v45, %v2163_v40  ;;  %v2170_v61 = vrot.slane %v2169_v49, 1  ;;  %v2155_v62 = vadd.f32 %v2154_v48, %v2153_v44 }
 0x3c1   :  { %v2172_v63 = vmul.f32 0.125, %v2165_v58  ;;  %v2174_v1 = vmul.f32 %v2156_v52, %v2156_v52  ;;  %v2171_v3 = vadd.f32 %v2170_v61, %v2169_v49  ;;  %v2157_v4 = vmul.f32 0.125, %v2155_v62 }
 0x3c3   :  { %v2176_v9 = vsub.f32 %v2172_v63, %v2174_v1  ;;  %v2173_v51 = vmul.f32 0.125, %v2171_v3  ;;  %v2175_v11 = vmul.f32 %v2157_v4, %v2157_v4 }
 0x3c5   :  { %v2179_v8 = vadd.f32 1e-05, %v2176_v9  ;;  %v2177_v29 = vsub.f32 %v2173_v51, %v2175_v11  ;;  %v2452_v11 = vld [vmem:[%s3737_s14] sm:$0x1] }
 0x3c7   :  { %v2180_v12 = vadd.f32 1e-05, %v2177_v29  ;;  %3138 = vrsqrt.f32 %v2179_v8 }
 0x3c9   :  { %3140 = vrsqrt.f32 %v2180_v12 }
 0x3d4   :  { %v3139_v32 = vpop.eup %3138 }
 0x3d6   :  { %v3141_v0 = vpop.eup %3140 }
 0x3d7   :  { %v2185_v41 = vcombine.low %v3139_v32, %v3141_v0 }
 0x3d9   :  { %v2192_v25 = vrot.slane %v2185_v41, %v3559_v5 }
 0x3db   :  { %v2199_v15 = vrot.slane %v2192_v25, %v3559_v5 }
 0x3dd   :  { %v2201_v19 = vmul.f32 %v2199_v15, %v2178_v14  ;;  %v2792_v14 = vld [vmem:[%s3739_s16] ss:$0 sm:$0xff] }
 0x3df   :  { %v2207_v22 = vrot.slane %v2201_v19, %v3429_v53  ;;  %v2211_v24 = vrot.slane %v2201_v19, %v3440_v57 }
 0x3e1   :  { %v2214_v26 = vmul.f32 %v2207_v22, %v2156_v52  ;;  %v2215_v30 = vmul.f32 %v2211_v24, %v2157_v4  ;;  %v2236_v21 = vmul.f32 %v2211_v24, %v2143_v16  ;;  %v2235_v10 = vmul.f32 %v2207_v22, %v2142_v42  ;;  %v3121_v42 = vld [vmem:[%s3738_s15] sm:$0xff]  }
 0x3e2   :  { %v2448_v4 = vld [vmem:[%s3736_s13] sm:$0x1]  ;;  %s3228_s13 = smov [#allocation7]  }
 0x3e3   :  { %v2218_v31 = vcombine.low %v2214_v26, %v2215_v30  ;;  %s2568_s14 = sshll.u32 %s3228_s13, 4  ;;  %s2569_s14 = int_to_ptr.vmem [resolvable:$true] %s2568_s14 }
 0x3e4   :  { %s3188_s16 = scalar_lea.vmem %s2569_s14, 128  ;;  %p3193_p11 = scmp.lt.s32.totalorder %s2569_s14, %s2569_s14 }
 0x3e5   :  { %v2225_v7 = vrot.slane %v2218_v31, %v3559_v5  ;;  %p3189_p10 = scmp.ne.s32.totalorder %s2569_s14, %s3188_s16  ;;  %p3194_p12 = scmp.lt.s32.totalorder %s3188_s16, %s3188_s16 }
 0x3e7   :  { %v2232_v20 = vrot.slane %v2225_v7, %v3559_v5  ;;  %v3119_v5 = vld [vmem:[%s3738_s15 + $0x10] sm:$0xff]   ;;  %p3195_p13 = por %p3194_p12, %p3193_p11 }
 0x3e8   :  { %2880 = vmatpush3.bf16.msra.mxu0 %v3119_v5 }
 0x3e9   :  { %v2234_v17 = vsub.f32 %v2202_v13, %v2232_v20  ;;  %2881 = vmatprep.subr.bf16.mxu0 %v3222_v2  ;;  %p3196_p0 = pnand %p3195_p13, %p3189_p10 }
 0x3eb   :  { %v2245_v6 = vrot.slane %v2234_v17, %v3440_v57  ;;  %v2241_v43 = vrot.slane %v2234_v17, %v3429_v53  ;;  %v3120_v57 = vld [vmem:[%s3738_s15 + $0x8] sm:$0xff]  }
 0x3ec   :  { %2882 = vmatpush3.bf16.msra.mxu0 %v3120_v57 }
 0x3ed   :  { %v2249_v50 = vadd.f32 %v2245_v6, %v2236_v21  ;;  %v2248_v23 = vadd.f32 %v2241_v43, %v2235_v10  ;;  %2883 = vmatprep.subr.bf16.mxu0 %v3222_v2 }
 0x3ef   :  { %v2251_v27 = vpack.c.bf16 %v2249_v50, %v2249_v50  ;;  %v2250_v54 = vpack.c.bf16 %v2248_v23, %v2248_v23 }
 0x3f0   :  { %2884 = vmatpush3.bf16.msra.mxu0 %v3121_v42 }
 0x3f1   :  { %2419 = vmatprep.mubr.bf16.mxu1 %v2251_v27 }
 0x3f2   :  { %2420 = vmatmul.mubr.bf16.vlgmr.msra.gmra.mxu1 %v2250_v54 }
 0x4b2   :  { %v2831_v16 = vpop.f32.mrf.mxu1 }
 0x4b4   :  { %v2832_v56 = vpop.f32.mrf.mxu1 }
 0x4b5   :  { %v2833_v34 = vadd.f32 %v2832_v56, %v2831_v16 }
 0x4b6   :  { %v2834_v55 = vpop.f32.mrf.mxu1 }
 0x4b7   :  { %v2422_v35 = vadd.f32 %v2833_v34, %v2775_v33 }
 0x4b8   :  { %v2835_v59 = vpop.f32.mrf.mxu1 }
 0x4b9   :  { %v2427_v46 = vmax.f32 %v2422_v35, 0.0 }
 0x4bb   :  { %v2437_v47 = vmul.f32 %v2427_v46, %v2427_v46  ;;  %v2429_v36 = vsel %vm2428_vm6, %v2427_v46, 0.0 }
 0x4bc   :  { %v2430_v37 = vrot.slane %v2429_v36, 4 }
 0x4bd   :  { %v2438_v38 = vsel %vm2428_vm6, %v2437_v47, 0.0 }
 0x4be   :  { %v2431_v2 = vadd.f32 %v2430_v37, %v2429_v36  ;;  %v2439_v39 = vrot.slane %v2438_v38, 4 }
 0x4c0   :  { %v2432_v40 = vrot.slane %v2431_v2, 2  ;;  %v2440_v44 = vadd.f32 %v2439_v39, %v2438_v38 }
 0x4c2   :  { %v2433_v28 = vadd.f32 %v2432_v40, %v2431_v2  ;;  %v2441_v60 = vrot.slane %v2440_v44, 2 }
 0x4c4   :  { %v2434_v45 = vrot.slane %v2433_v28, 1  ;;  %v2442_v48 = vadd.f32 %v2441_v60, %v2440_v44 }
 0x4c6   :  { %v2435_v49 = vadd.f32 %v2434_v45, %v2433_v28  ;;  %v2443_v52 = vrot.slane %v2442_v48, 1 }
 0x4c8   :  { %v2436_v58 = vmul.f32 0.125, %v2435_v49  ;;  %v2444_v61 = vadd.f32 %v2443_v52, %v2442_v48 }
 0x4ca   :  { %v2445_v62 = vmul.f32 0.125, %v2444_v61  ;;  %v2446_v63 = vmul.f32 %v2436_v58, %v2436_v58 }
 0x4cc   :  { %v2447_v1 = vsub.f32 %v2445_v62, %v2446_v63 }
 0x4ce   :  { %v2449_v3 = vadd.f32 1e-05, %v2447_v1 }
 0x4d0   :  { %3142 = vrsqrt.f32 %v2449_v3 }
 0x4dd   :  { %v3143_v9 = vpop.eup %3142 }
 0x4de   :  { %v2451_v51 = vmul.f32 %v3143_v9, %v2448_v4 }
 0x4e0   :  { %v2453_v8 = vmul.f32 %v2451_v51, %v2436_v58  ;;  %v2459_v29 = vrot.slane %v2451_v51, %v3429_v53 }
 0x4e2   :  { %v2454_v12 = vsub.f32 %v2452_v11, %v2453_v8  ;;  %v2461_v32 = vmul.f32 %v2459_v29, %v2427_v46 }
 0x4e4   :  { %v2466_v0 = vrot.slane %v2454_v12, %v3429_v53 }
 0x4e6   :  { %v2468_v41 = vadd.f32 %v2466_v0, %v2461_v32 }
 0x4e8   :  { %v2469_v25 = vpack.c.bf16 %v2468_v41, %v2468_v41 }
 0x4ea   :  { %2886 = vmatmul.mubr.msk.bf16.vlgmr.msra.gmra.mxu0 %vm2428_vm6, %v2469_v25 }
 0x5aa   :  { %v2546_v15 = vpop.f32.mrf.mxu0 }
 0x5ab   :  { %v2547_v19 = vadd.f32 %v2792_v14, %v2546_v15 }
 0x5ac   :  { %v2887_v22 = vpop.f32.mrf.mxu0 }
 0x5ad   :  { %2552 = vmax.xlane.f32.xlu0 %v2547_v19 }
 0x5ae   :  { %v2549_v24 = vpop.f32.mrf.mxu0 }
 0x5b0   :  { %v2888_v26 = vpop.f32.mrf.mxu0 }
 0x636   :  { %v2553_v30 = vpop.xlane.xlu0 %2552 }
 0x637   :  { %v2554_v31 = vsub.f32 %v2547_v19, %v2553_v30 }
 0x639   :  { %v2555_v7 = vmul.f32 1.442695, %v2554_v31 }
 0x63b   :  { %3144 = vpow2.f32 %v2555_v7 }
 0x648   :  { %v3145_v13 = vpop.eup %3144 }
 0x649   :  { %2557 = vadd.xlane.f32.xlu1 %v3145_v13 }
 0x6d2   :  { %v2558_v53 = vpop.xlane.xlu1 %2557 }
 0x6d3   :  { %3146 = vrcp.f32 %v2558_v53 }
 0x6e0   :  { %v3147_v20 = vpop.eup %3146 }
 0x6e1   :  { %v2560_v17 = vmul.f32 %v3147_v20, %v3145_v13 }
 0x6e3   :  { %2561 = vst [vmem:[#allocation7] sm:$0xff] %v2560_v17 }
 0x6e4   :  { %3199 = shalt.err (!%p3196_p0)
}
 0x6e5   :  { %2571 = dma.vmem_to_hbm [thread:$0]  %s2569_s14, 128, %s3740_s17, [#allocation4]  }
 0x6e6   :  { %3212 = dma.done.wait [#allocation4], 128  }
 0x6e7   :  { %3213 = vsyncadd [#allocation4], 4294967168 }
 0x6e8   :  { %2575 = vsyncpa [#allocation3], 1 }
 0x6e9   :  { %2576 = vsyncpa [#allocation6], 1 }
 0x6ea   :  { %2577 = vsyncpa [#allocation4], 1 }

</bundles_post_ra>
